<compile_context>
chip_gen: v5e
topology: v5e:2x2
jax: 0.10.0
libtpu: 0.0.40
codegen_flags: <defaults>
</compile_context>

<pallas_src>
from functools import partial

import numpy as np
import jax
import jax.numpy as jnp
from jax.experimental import pallas as pl
from jax.experimental.pallas import tpu as pltpu

# ---- module configuration (DepthSepDeConv2d(normal=False, groups=None)) ----
IN_CH = 4
OUT_CH = 8
KERNEL_SIZE = (2, 3)   # (k_t, k_f)
STRIDE = (1, 2)        # (s_t, s_f)
DILATION = (1, 1)
SLICES = (1, -1)       # used by DilatDeConv2d when s_f == 2


def _vmem_capacity_bytes() -> int:
    """Physical VMEM of the local TPU generation (fallback: v7x's 64 MiB)."""
    try:
        return int(pltpu.get_tpu_info().vmem_capacity_bytes)
    except Exception:
        return 64 * 1024 * 1024


_VMEM_CAP = _vmem_capacity_bytes()


def _vmem_limit_bytes() -> int:
    return int(min(_VMEM_CAP, 128 * 1024 * 1024) * 0.85)


def _pick_t_tile(t, cin, cout, f, fo, x_itemsize, out_itemsize, requested=None):
    """T-chunk: largest multiple of 8 whose double-buffered working set fits the
    generation's VMEM budget (or the full T extent when it fits)."""
    if requested is not None:
        tt = max(1, min(int(requested), t))
        if tt < t:
            tt = max(8, (tt // 8) * 8)
        return min(tt, t)
    budget = int(_VMEM_CAP * 0.4)     # headroom for temporaries + double buffers
    per_row = 2 * (cin * f * x_itemsize + cout * fo * out_itemsize) \
        + 6 * max(f, fo) * 4          # yc / yc_tm1 / matmul temporaries
    fixed = 8 * f * fo * 4            # iota masks + per-channel A/B matrices
    cap = max(8, (budget - fixed) // max(per_row, 1))
    if t <= cap:
        return t
    return max(8, (min(cap, t) // 8) * 8)


# ----------------------------- fused kernel ---------------------------------
def _fused_kernel(x_ref, xh_ref, wp_ref, bp_ref, wd_ref, bd_ref, out_ref):
    """point_conv (1x1) + depthwise ConvTranspose2d((2,3), stride (1,2)) + crop,
    writing the frequency-interleaved output directly.

    x_ref   : (1, Cin, Tt, F)      VMEM  input chunk
    xh_ref  : (1, Cin, Hr, F)      VMEM  x rows ending just above this chunk
    wp_ref  : (Cout, Cin)          SMEM  1x1 conv weight
    bp_ref  : (Cout,)              SMEM  1x1 conv bias
    wd_ref  : (Cout, 6)            SMEM  depthwise taps, index = kt*3 + kf
    bd_ref  : (Cout,)              SMEM  depthwise bias
    out_ref : (1, Cout, Tt, 2F-1)  VMEM  final (cropped, interleaved) output
    """
    cin = x_ref.shape[1]
    f = x_ref.shape[3]
    cout, tt, fo = out_ref.shape[1], out_ref.shape[2], out_ref.shape[3]
    hrows = xh_ref.shape[2]

    # Frequency scatter/interleave masks: E_kf[j, o] == 1 iff (o + 1) == 2*j + kf.
    # (Output freq o maps to full ConvTranspose freq o+1 after the 1:-1 crop.)
    two_j = 2 * jax.lax.broadcasted_iota(jnp.int32, (f, fo), 0)
    o_p1 = jax.lax.broadcasted_iota(jnp.int32, (f, fo), 1) + 1
    e0 = (o_p1 == two_j).astype(jnp.float32)          # kf = 0
    e1 = (o_p1 == two_j + 1).astype(jnp.float32)      # kf = 1
    e2 = (o_p1 == two_j + 2).astype(jnp.float32)      # kf = 2

    # Hoisted input loads/casts (ref reads are not CSE'd across channels).
    xs = [x_ref[0, ci].astype(jnp.float32) for ci in range(cin)]            # (Tt, F)
    xh = [xh_ref[0, ci, hrows - 1:hrows, :].astype(jnp.float32)             # (1, F)
          for ci in range(cin)]
    # The y row above the very first chunk does not exist -> zero its contribution.
    halo_valid = jnp.where(pl.program_id(1) > 0, 1.0, 0.0).astype(jnp.float32)

    # Channel loops are tiny (Cout=8, Cin=4) and fully unrolled at trace time.
    for co in range(cout):
        # ---- 1x1 point conv on the VPU (scalar weights from SMEM) ----
        yc = wp_ref[co, 0] * xs[0]
        yp = wp_ref[co, 0] * xh[0]
        for ci in range(1, cin):
            yc = yc + wp_ref[co, ci] * xs[ci]
            yp = yp + wp_ref[co, ci] * xh[ci]
        yc = yc + bp_ref[co]                          # y[t] for this chunk   (Tt, F)
        yp = (yp + bp_ref[co]) * halo_valid           # y[t-1] for the first row (1, F)

        # kt=1 operand: y shifted down one frame.  (Sublane concat; pltpu.roll
        # needs native-tile-multiple shapes the small test F does not satisfy.)
        yc_tm1 = jnp.concatenate([yp, yc[: tt - 1, :]], axis=0)

        # Per-channel frequency-deconv matrices; they also perform the even/odd
        # lane interleave, so the output is produced in its final layout.
        a = wd_ref[co, 0] * e0 + wd_ref[co, 1] * e1 + wd_ref[co, 2] * e2
        b = wd_ref[co, 3] * e0 + wd_ref[co, 4] * e1 + wd_ref[co, 5] * e2

        out = (jnp.dot(yc, a, preferred_element_type=jnp.float32)
               + jnp.dot(yc_tm1, b, preferred_element_type=jnp.float32)
               + bd_ref[co])
        out_ref[0, co] = out.astype(out_ref.dtype)


# --------------------------------- wrapper -----------------------------------
@partial(jax.jit, static_argnames=("t_tile", "out_dtype"))
def depth_sep_deconv2d(x, w_p, b_p, w_d, b_d, *, t_tile=None,
                       out_dtype=jnp.float32):
    """DepthSepDeConv2d(normal=False): (N, Cin, T, F) -> (N, Cout, T, 2F-1)."""
    n, cin, t, f = x.shape
    cout = w_p.shape[0]
    kt, kf = KERNEL_SIZE
    fo = 2 * f - 1

    # Small parameter tables -> SMEM-friendly 2-D / 1-D f32 arrays.
    w_p2 = w_p.reshape(cout, cin).astype(jnp.float32)
    b_p2 = b_p.reshape(cout).astype(jnp.float32)
    w_d2 = w_d.reshape(cout, kt * kf).astype(jnp.float32)   # [co, kt*3 + kf]
    b_d2 = b_d.reshape(cout).astype(jnp.float32)

    out_itemsize = jnp.dtype(out_dtype).itemsize
    tt = _pick_t_tile(t, cin, cout, f, fo, x.dtype.itemsize, out_itemsize, t_tile)
    hrows = min(8, t)                       # halo block rows (8-aligned when T>=8)
    hsteps = max(1, tt // hrows)
    grid = (n, pl.cdiv(t, tt))

    flops = 2 * n * cout * cin * t * f + 4 * n * cout * t * f * fo
    bytes_accessed = (x.size * x.dtype.itemsize
                      + n * cout * t * fo * out_itemsize
                      + (w_p2.size + b_p2.size + w_d2.size + b_d2.size) * 4)

    return pl.pallas_call(
        _fused_kernel,
        out_shape=jax.ShapeDtypeStruct((n, cout, t, fo), out_dtype),
        grid=grid,
        in_specs=[
            pl.BlockSpec((1, cin, tt, f), lambda b, c: (b, 0, c, 0)),
            # Halo: the hrows-row x block ending at row c*tt - 1 (clamped; the
            # c == 0 contribution is zeroed in-kernel).
            pl.BlockSpec((1, cin, hrows, f),
                         lambda b, c: (b, 0, jnp.maximum(c * hsteps - 1, 0), 0)),
            pl.BlockSpec(memory_space=pltpu.MemorySpace.SMEM),   # w_p
            pl.BlockSpec(memory_space=pltpu.MemorySpace.SMEM),   # b_p
            pl.BlockSpec(memory_space=pltpu.MemorySpace.SMEM),   # w_d
            pl.BlockSpec(memory_space=pltpu.MemorySpace.SMEM),   # b_d
        ],
        out_specs=pl.BlockSpec((1, cout, tt, fo), lambda b, c: (b, 0, c, 0)),
        compiler_params=pltpu.CompilerParams(
            # Both axes are independent now (no carried state): megacore / v7x
            # second TensorCore gets used even when N == 1.
            dimension_semantics=("parallel", "parallel"),
            vmem_limit_bytes=_vmem_limit_bytes(),
        ),
        cost_estimate=pl.CostEstimate(flops=flops, transcendentals=0,
                                      bytes_accessed=bytes_accessed),
    )(x, x, w_p2, b_p2, w_d2, b_d2)


# ------------------------------ numpy reference -----------------------------
def reference_forward(x, w_p, b_p, w_d, b_d):
    x = np.asarray(x, np.float64)
    w_p = np.asarray(w_p, np.float64)
    b_p = np.asarray(b_p, np.float64)
    w_d = np.asarray(w_d, np.float64)
    b_d = np.asarray(b_d, np.float64)
    n, cin, t, f = x.shape
    cout = w_p.shape[0]
    # 1x1 conv
    y = np.einsum('oc,nctf->notf', w_p, x) + b_p[None, :, None, None]
    # depthwise ConvTranspose2d, groups == channels
    kt_, kf_ = KERNEL_SIZE
    st, sf = STRIDE
    tout = (t - 1) * st + kt_
    fout = (f - 1) * sf + kf_
    out = np.zeros((n, cout, tout, fout), np.float64) + b_d[None, :, None, None]
    for it in range(t):
        for jf in range(f):
            for kt in range(kt_):
                for kf in range(kf_):
                    out[:, :, it * st + kt, jf * sf + kf] += (
                        y[:, :, it, jf] * w_d[None, :, kt, kf])
    # DilatDeConv2d crop: k_t_eff = 2 > 1, s_f = 2 -> slices
    return out[:, :, :-(kt_ - 1), SLICES[0]:SLICES[1]]


# ------------------------------------ main -----------------------------------
if __name__ == "__main__":
    N, T, F = 2, 16, 16
    key = jax.random.PRNGKey(0)
    k1, k2, k3, k4, k5 = jax.random.split(key, 5)
    x = jax.random.normal(k1, (N, IN_CH, T, F), jnp.float32)
    w_p = jax.random.normal(k2, (OUT_CH, IN_CH), jnp.float32) * 0.5   # 1x1 weight
    b_p = jax.random.normal(k3, (OUT_CH,), jnp.float32) * 0.1
    w_d = jax.random.normal(k4, (OUT_CH,) + KERNEL_SIZE, jnp.float32) * 0.5
    b_d = jax.random.normal(k5, (OUT_CH,), jnp.float32) * 0.1

    ref = reference_forward(x, w_p, b_p, w_d, b_d)

    # Default tiling: a single T-chunk per batch element.
    out = jax.block_until_ready(depth_sep_deconv2d(x, w_p, b_p, w_d, b_d))
    # Forced T tiling (two 8-frame chunks) to exercise the input-side time halo.
    out_tiled = jax.block_until_ready(
        depth_sep_deconv2d(x, w_p, b_p, w_d, b_d, t_tile=8))

    assert out.shape == out_tiled.shape == ref.shape == (N, OUT_CH, T, 2 * F - 1), (
        out.shape, out_tiled.shape, ref.shape)
    # The two tilings must agree essentially exactly (validates the halo logic
    # independently of MXU rounding).
    np.testing.assert_allclose(np.asarray(out), np.asarray(out_tiled),
                               rtol=1e-5, atol=1e-5)
    # vs. the f64 reference: the frequency-scatter matmuls run on the MXU, whose
    # fp32 emulation may be as coarse as single-pass bf16 depending on the
    # Mosaic default, so the tolerance is sized for that worst case; genuine
    # logic errors (wrong taps / offsets / interleave) produce O(0.1 - 1) errors.
    np.testing.assert_allclose(np.asarray(out), ref, rtol=2e-2, atol=5e-2)
    np.testing.assert_allclose(np.asarray(out_tiled), ref, rtol=2e-2, atol=5e-2)
    print("KERNEL_OK")
</pallas_src>

<mosaic_0001>
module attributes {stable_mosaic.version = 11 : i64} {
  func.func @_fused_kernel(%arg0: i32, %arg1: i32, %arg2: memref<1x4x16x16xf32, #tpu.memory_space<vmem>>, %arg3: memref<1x4x8x16xf32, #tpu.memory_space<vmem>>, %arg4: memref<8x4xf32, #tpu.memory_space<smem>>, %arg5: memref<8xf32, #tpu.memory_space<smem>>, %arg6: memref<8x6xf32, #tpu.memory_space<smem>>, %arg7: memref<8xf32, #tpu.memory_space<smem>>, %arg8: memref<1x8x16x31xf32, #tpu.memory_space<vmem>>) attributes {dimension_semantics = [#tpu.dimension_semantics<parallel>, #tpu.dimension_semantics<parallel>], iteration_bounds = array<i64: 2, 1>, scalar_prefetch = 0 : i64, scratch_operands = 0 : i64, tpu.core_type = #tpu.core_type<tc>, window_params = [{transform_indices = @transform_0, window_bounds = array<i64: 1, 4, 16, 16>}, {transform_indices = @transform_1, window_bounds = array<i64: 1, 4, 8, 16>}, {transform_indices = @transform_2, window_bounds = array<i64: 8, 4>}, {transform_indices = @transform_3, window_bounds = array<i64: 8>}, {transform_indices = @transform_4, window_bounds = array<i64: 8, 6>}, {transform_indices = @transform_5, window_bounds = array<i64: 8>}, {transform_indices = @transform_6, window_bounds = array<i64: 1, 8, 16, 31>}]} {
    %0 = tpu.iota {dimensions = array<i32: 0>} : vector<16x31xi32>
    %c2_i32 = arith.constant 2 : i32
    %1 = vector.broadcast %c2_i32 : i32 to vector<16x31xi32>
    %2 = arith.muli %1, %0 : vector<16x31xi32>
    %3 = tpu.iota {dimensions = array<i32: 1>} : vector<16x31xi32>
    %c1_i32 = arith.constant 1 : i32
    %4 = vector.broadcast %c1_i32 : i32 to vector<16x31xi32>
    %5 = arith.addi %3, %4 : vector<16x31xi32>
    %6 = arith.cmpi eq, %5, %2 : vector<16x31xi32>
    %7 = arith.extui %6 : vector<16x31xi1> to vector<16x31xi32>
    %8 = arith.sitofp %7 : vector<16x31xi32> to vector<16x31xf32>
    %c1_i32_0 = arith.constant 1 : i32
    %9 = vector.broadcast %c1_i32_0 : i32 to vector<16x31xi32>
    %10 = arith.addi %2, %9 : vector<16x31xi32>
    %11 = arith.cmpi eq, %5, %10 : vector<16x31xi32>
    %12 = arith.extui %11 : vector<16x31xi1> to vector<16x31xi32>
    %13 = arith.sitofp %12 : vector<16x31xi32> to vector<16x31xf32>
    %c2_i32_1 = arith.constant 2 : i32
    %14 = vector.broadcast %c2_i32_1 : i32 to vector<16x31xi32>
    %15 = arith.addi %2, %14 : vector<16x31xi32>
    %16 = arith.cmpi eq, %5, %15 : vector<16x31xi32>
    %17 = arith.extui %16 : vector<16x31xi1> to vector<16x31xi32>
    %18 = arith.sitofp %17 : vector<16x31xi32> to vector<16x31xf32>
    %c0 = arith.constant 0 : index
    %c0_2 = arith.constant 0 : index
    %c0_3 = arith.constant 0 : index
    %c0_4 = arith.constant 0 : index
    %19 = vector.load %arg2[%c0, %c0_2, %c0_3, %c0_4] : memref<1x4x16x16xf32, #tpu.memory_space<vmem>>, vector<1x1x16x16xf32>
    %20 = vector.shape_cast %19 : vector<1x1x16x16xf32> to vector<16x16xf32>
    %c0_5 = arith.constant 0 : index
    %c1 = arith.constant 1 : index
    %c0_6 = arith.constant 0 : index
    %c0_7 = arith.constant 0 : index
    %21 = vector.load %arg2[%c0_5, %c1, %c0_6, %c0_7] : memref<1x4x16x16xf32, #tpu.memory_space<vmem>>, vector<1x1x16x16xf32>
    %22 = vector.shape_cast %21 : vector<1x1x16x16xf32> to vector<16x16xf32>
    %c0_8 = arith.constant 0 : index
    %c2 = arith.constant 2 : index
    %c0_9 = arith.constant 0 : index
    %c0_10 = arith.constant 0 : index
    %23 = vector.load %arg2[%c0_8, %c2, %c0_9, %c0_10] : memref<1x4x16x16xf32, #tpu.memory_space<vmem>>, vector<1x1x16x16xf32>
    %24 = vector.shape_cast %23 : vector<1x1x16x16xf32> to vector<16x16xf32>
    %c0_11 = arith.constant 0 : index
    %c3 = arith.constant 3 : index
    %c0_12 = arith.constant 0 : index
    %c0_13 = arith.constant 0 : index
    %25 = vector.load %arg2[%c0_11, %c3, %c0_12, %c0_13] : memref<1x4x16x16xf32, #tpu.memory_space<vmem>>, vector<1x1x16x16xf32>
    %26 = vector.shape_cast %25 : vector<1x1x16x16xf32> to vector<16x16xf32>
    %c0_14 = arith.constant 0 : index
    %c0_15 = arith.constant 0 : index
    %c7 = arith.constant 7 : index
    %c0_16 = arith.constant 0 : index
    %27 = vector.load %arg3[%c0_14, %c0_15, %c7, %c0_16] : memref<1x4x8x16xf32, #tpu.memory_space<vmem>>, vector<1x1x1x16xf32>
    %28 = vector.shape_cast %27 : vector<1x1x1x16xf32> to vector<1x16xf32>
    %c0_17 = arith.constant 0 : index
    %c1_18 = arith.constant 1 : index
    %c7_19 = arith.constant 7 : index
    %c0_20 = arith.constant 0 : index
    %29 = vector.load %arg3[%c0_17, %c1_18, %c7_19, %c0_20] : memref<1x4x8x16xf32, #tpu.memory_space<vmem>>, vector<1x1x1x16xf32>
    %30 = vector.shape_cast %29 : vector<1x1x1x16xf32> to vector<1x16xf32>
    %c0_21 = arith.constant 0 : index
    %c2_22 = arith.constant 2 : index
    %c7_23 = arith.constant 7 : index
    %c0_24 = arith.constant 0 : index
    %31 = vector.load %arg3[%c0_21, %c2_22, %c7_23, %c0_24] : memref<1x4x8x16xf32, #tpu.memory_space<vmem>>, vector<1x1x1x16xf32>
    %32 = vector.shape_cast %31 : vector<1x1x1x16xf32> to vector<1x16xf32>
    %c0_25 = arith.constant 0 : index
    %c3_26 = arith.constant 3 : index
    %c7_27 = arith.constant 7 : index
    %c0_28 = arith.constant 0 : index
    %33 = vector.load %arg3[%c0_25, %c3_26, %c7_27, %c0_28] : memref<1x4x8x16xf32, #tpu.memory_space<vmem>>, vector<1x1x1x16xf32>
    %34 = vector.shape_cast %33 : vector<1x1x1x16xf32> to vector<1x16xf32>
    %c0_i32 = arith.constant 0 : i32
    %35 = arith.cmpi sgt, %arg1, %c0_i32 : i32
    %cst = arith.constant 1.000000e+00 : f32
    %cst_29 = arith.constant 0.000000e+00 : f32
    %36 = arith.select %35, %cst, %cst_29 : f32
    %c0_30 = arith.constant 0 : index
    %c0_31 = arith.constant 0 : index
    %37 = memref.load %arg4[%c0_30, %c0_31] : memref<8x4xf32, #tpu.memory_space<smem>>
    %38 = vector.broadcast %37 : f32 to vector<16x16xf32>
    %39 = arith.mulf %38, %20 : vector<16x16xf32>
    %c0_32 = arith.constant 0 : index
    %c0_33 = arith.constant 0 : index
    %40 = memref.load %arg4[%c0_32, %c0_33] : memref<8x4xf32, #tpu.memory_space<smem>>
    %41 = vector.broadcast %40 : f32 to vector<1x16xf32>
    %42 = arith.mulf %41, %28 : vector<1x16xf32>
    %c0_34 = arith.constant 0 : index
    %c1_35 = arith.constant 1 : index
    %43 = memref.load %arg4[%c0_34, %c1_35] : memref<8x4xf32, #tpu.memory_space<smem>>
    %44 = vector.broadcast %43 : f32 to vector<16x16xf32>
    %45 = arith.mulf %44, %22 : vector<16x16xf32>
    %46 = arith.addf %39, %45 : vector<16x16xf32>
    %c0_36 = arith.constant 0 : index
    %c1_37 = arith.constant 1 : index
    %47 = memref.load %arg4[%c0_36, %c1_37] : memref<8x4xf32, #tpu.memory_space<smem>>
    %48 = vector.broadcast %47 : f32 to vector<1x16xf32>
    %49 = arith.mulf %48, %30 : vector<1x16xf32>
    %50 = arith.addf %42, %49 : vector<1x16xf32>
    %c0_38 = arith.constant 0 : index
    %c2_39 = arith.constant 2 : index
    %51 = memref.load %arg4[%c0_38, %c2_39] : memref<8x4xf32, #tpu.memory_space<smem>>
    %52 = vector.broadcast %51 : f32 to vector<16x16xf32>
    %53 = arith.mulf %52, %24 : vector<16x16xf32>
    %54 = arith.addf %46, %53 : vector<16x16xf32>
    %c0_40 = arith.constant 0 : index
    %c2_41 = arith.constant 2 : index
    %55 = memref.load %arg4[%c0_40, %c2_41] : memref<8x4xf32, #tpu.memory_space<smem>>
    %56 = vector.broadcast %55 : f32 to vector<1x16xf32>
    %57 = arith.mulf %56, %32 : vector<1x16xf32>
    %58 = arith.addf %50, %57 : vector<1x16xf32>
    %c0_42 = arith.constant 0 : index
    %c3_43 = arith.constant 3 : index
    %59 = memref.load %arg4[%c0_42, %c3_43] : memref<8x4xf32, #tpu.memory_space<smem>>
    %60 = vector.broadcast %59 : f32 to vector<16x16xf32>
    %61 = arith.mulf %60, %26 : vector<16x16xf32>
    %62 = arith.addf %54, %61 : vector<16x16xf32>
    %c0_44 = arith.constant 0 : index
    %c3_45 = arith.constant 3 : index
    %63 = memref.load %arg4[%c0_44, %c3_45] : memref<8x4xf32, #tpu.memory_space<smem>>
    %64 = vector.broadcast %63 : f32 to vector<1x16xf32>
    %65 = arith.mulf %64, %34 : vector<1x16xf32>
    %66 = arith.addf %58, %65 : vector<1x16xf32>
    %c0_46 = arith.constant 0 : index
    %67 = memref.load %arg5[%c0_46] : memref<8xf32, #tpu.memory_space<smem>>
    %68 = vector.broadcast %67 : f32 to vector<16x16xf32>
    %69 = arith.addf %62, %68 : vector<16x16xf32>
    %c0_47 = arith.constant 0 : index
    %70 = memref.load %arg5[%c0_47] : memref<8xf32, #tpu.memory_space<smem>>
    %71 = vector.broadcast %70 : f32 to vector<1x16xf32>
    %72 = arith.addf %66, %71 : vector<1x16xf32>
    %73 = vector.broadcast %36 : f32 to vector<1x16xf32>
    %74 = arith.mulf %72, %73 : vector<1x16xf32>
    %75 = vector.extract_strided_slice %69 {offsets = [0, 0], sizes = [15, 16], strides = [1, 1]} : vector<16x16xf32> to vector<15x16xf32>
    %76 = tpu.concatenate %74, %75 in 0 : vector<1x16xf32>, vector<15x16xf32> -> vector<16x16xf32>
    %c0_48 = arith.constant 0 : index
    %c0_49 = arith.constant 0 : index
    %77 = memref.load %arg6[%c0_48, %c0_49] : memref<8x6xf32, #tpu.memory_space<smem>>
    %78 = vector.broadcast %77 : f32 to vector<16x31xf32>
    %79 = arith.mulf %78, %8 : vector<16x31xf32>
    %c0_50 = arith.constant 0 : index
    %c1_51 = arith.constant 1 : index
    %80 = memref.load %arg6[%c0_50, %c1_51] : memref<8x6xf32, #tpu.memory_space<smem>>
    %81 = vector.broadcast %80 : f32 to vector<16x31xf32>
    %82 = arith.mulf %81, %13 : vector<16x31xf32>
    %83 = arith.addf %79, %82 : vector<16x31xf32>
    %c0_52 = arith.constant 0 : index
    %c2_53 = arith.constant 2 : index
    %84 = memref.load %arg6[%c0_52, %c2_53] : memref<8x6xf32, #tpu.memory_space<smem>>
    %85 = vector.broadcast %84 : f32 to vector<16x31xf32>
    %86 = arith.mulf %85, %18 : vector<16x31xf32>
    %87 = arith.addf %83, %86 : vector<16x31xf32>
    %c0_54 = arith.constant 0 : index
    %c3_55 = arith.constant 3 : index
    %88 = memref.load %arg6[%c0_54, %c3_55] : memref<8x6xf32, #tpu.memory_space<smem>>
    %89 = vector.broadcast %88 : f32 to vector<16x31xf32>
    %90 = arith.mulf %89, %8 : vector<16x31xf32>
    %c0_56 = arith.constant 0 : index
    %c4 = arith.constant 4 : index
    %91 = memref.load %arg6[%c0_56, %c4] : memref<8x6xf32, #tpu.memory_space<smem>>
    %92 = vector.broadcast %91 : f32 to vector<16x31xf32>
    %93 = arith.mulf %92, %13 : vector<16x31xf32>
    %94 = arith.addf %90, %93 : vector<16x31xf32>
    %c0_57 = arith.constant 0 : index
    %c5 = arith.constant 5 : index
    %95 = memref.load %arg6[%c0_57, %c5] : memref<8x6xf32, #tpu.memory_space<smem>>
    %96 = vector.broadcast %95 : f32 to vector<16x31xf32>
    %97 = arith.mulf %96, %18 : vector<16x31xf32>
    %98 = arith.addf %94, %97 : vector<16x31xf32>
    %cst_58 = arith.constant dense<0.000000e+00> : vector<16x31xf32>
    %99 = tpu.matmul %69, %87, %cst_58 {dimension_numbers = #tpu.dot_dimension_numbers<[1], [0], [0], [1], [0, 0, 1, 1], [], []>} : vector<16x16xf32>, vector<16x31xf32>, vector<16x31xf32> -> vector<16x31xf32>
    %cst_59 = arith.constant dense<0.000000e+00> : vector<16x31xf32>
    %100 = tpu.matmul %76, %98, %cst_59 {dimension_numbers = #tpu.dot_dimension_numbers<[1], [0], [0], [1], [0, 0, 1, 1], [], []>} : vector<16x16xf32>, vector<16x31xf32>, vector<16x31xf32> -> vector<16x31xf32>
    %101 = arith.addf %99, %100 : vector<16x31xf32>
    %c0_60 = arith.constant 0 : index
    %102 = memref.load %arg7[%c0_60] : memref<8xf32, #tpu.memory_space<smem>>
    %103 = vector.broadcast %102 : f32 to vector<16x31xf32>
    %104 = arith.addf %101, %103 : vector<16x31xf32>
    %c0_61 = arith.constant 0 : index
    %c0_62 = arith.constant 0 : index
    %c0_63 = arith.constant 0 : index
    %c0_64 = arith.constant 0 : index
    %105 = vector.load %arg8[%c0_61, %c0_62, %c0_63, %c0_64] : memref<1x8x16x31xf32, #tpu.memory_space<vmem>>, vector<1x1x16x31xf32>
    %106 = vector.shape_cast %105 : vector<1x1x16x31xf32> to vector<16x31xf32>
    %107 = vector.shape_cast %104 : vector<16x31xf32> to vector<1x1x16x31xf32>
    tpu.vector_store %arg8[%c0_61, %c0_62, %c0_63, %c0_64], %107 {strides = array<i32>} : memref<1x8x16x31xf32, #tpu.memory_space<vmem>>, vector<1x1x16x31xf32>,
    %c1_65 = arith.constant 1 : index
    %c0_66 = arith.constant 0 : index
    %108 = memref.load %arg4[%c1_65, %c0_66] : memref<8x4xf32, #tpu.memory_space<smem>>
    %109 = vector.broadcast %108 : f32 to vector<16x16xf32>
    %110 = arith.mulf %109, %20 : vector<16x16xf32>
    %c1_67 = arith.constant 1 : index
    %c0_68 = arith.constant 0 : index
    %111 = memref.load %arg4[%c1_67, %c0_68] : memref<8x4xf32, #tpu.memory_space<smem>>
    %112 = vector.broadcast %111 : f32 to vector<1x16xf32>
    %113 = arith.mulf %112, %28 : vector<1x16xf32>
    %c1_69 = arith.constant 1 : index
    %c1_70 = arith.constant 1 : index
    %114 = memref.load %arg4[%c1_69, %c1_70] : memref<8x4xf32, #tpu.memory_space<smem>>
    %115 = vector.broadcast %114 : f32 to vector<16x16xf32>
    %116 = arith.mulf %115, %22 : vector<16x16xf32>
    %117 = arith.addf %110, %116 : vector<16x16xf32>
    %c1_71 = arith.constant 1 : index
    %c1_72 = arith.constant 1 : index
    %118 = memref.load %arg4[%c1_71, %c1_72] : memref<8x4xf32, #tpu.memory_space<smem>>
    %119 = vector.broadcast %118 : f32 to vector<1x16xf32>
    %120 = arith.mulf %119, %30 : vector<1x16xf32>
    %121 = arith.addf %113, %120 : vector<1x16xf32>
    %c1_73 = arith.constant 1 : index
    %c2_74 = arith.constant 2 : index
    %122 = memref.load %arg4[%c1_73, %c2_74] : memref<8x4xf32, #tpu.memory_space<smem>>
    %123 = vector.broadcast %122 : f32 to vector<16x16xf32>
    %124 = arith.mulf %123, %24 : vector<16x16xf32>
    %125 = arith.addf %117, %124 : vector<16x16xf32>
    %c1_75 = arith.constant 1 : index
    %c2_76 = arith.constant 2 : index
    %126 = memref.load %arg4[%c1_75, %c2_76] : memref<8x4xf32, #tpu.memory_space<smem>>
    %127 = vector.broadcast %126 : f32 to vector<1x16xf32>
    %128 = arith.mulf %127, %32 : vector<1x16xf32>
    %129 = arith.addf %121, %128 : vector<1x16xf32>
    %c1_77 = arith.constant 1 : index
    %c3_78 = arith.constant 3 : index
    %130 = memref.load %arg4[%c1_77, %c3_78] : memref<8x4xf32, #tpu.memory_space<smem>>
    %131 = vector.broadcast %130 : f32 to vector<16x16xf32>
    %132 = arith.mulf %131, %26 : vector<16x16xf32>
    %133 = arith.addf %125, %132 : vector<16x16xf32>
    %c1_79 = arith.constant 1 : index
    %c3_80 = arith.constant 3 : index
    %134 = memref.load %arg4[%c1_79, %c3_80] : memref<8x4xf32, #tpu.memory_space<smem>>
    %135 = vector.broadcast %134 : f32 to vector<1x16xf32>
    %136 = arith.mulf %135, %34 : vector<1x16xf32>
    %137 = arith.addf %129, %136 : vector<1x16xf32>
    %c1_81 = arith.constant 1 : index
    %138 = memref.load %arg5[%c1_81] : memref<8xf32, #tpu.memory_space<smem>>
    %139 = vector.broadcast %138 : f32 to vector<16x16xf32>
    %140 = arith.addf %133, %139 : vector<16x16xf32>
    %c1_82 = arith.constant 1 : index
    %141 = memref.load %arg5[%c1_82] : memref<8xf32, #tpu.memory_space<smem>>
    %142 = vector.broadcast %141 : f32 to vector<1x16xf32>
    %143 = arith.addf %137, %142 : vector<1x16xf32>
    %144 = vector.broadcast %36 : f32 to vector<1x16xf32>
    %145 = arith.mulf %143, %144 : vector<1x16xf32>
    %146 = vector.extract_strided_slice %140 {offsets = [0, 0], sizes = [15, 16], strides = [1, 1]} : vector<16x16xf32> to vector<15x16xf32>
    %147 = tpu.concatenate %145, %146 in 0 : vector<1x16xf32>, vector<15x16xf32> -> vector<16x16xf32>
    %c1_83 = arith.constant 1 : index
    %c0_84 = arith.constant 0 : index
    %148 = memref.load %arg6[%c1_83, %c0_84] : memref<8x6xf32, #tpu.memory_space<smem>>
    %149 = vector.broadcast %148 : f32 to vector<16x31xf32>
    %150 = arith.mulf %149, %8 : vector<16x31xf32>
    %c1_85 = arith.constant 1 : index
    %c1_86 = arith.constant 1 : index
    %151 = memref.load %arg6[%c1_85, %c1_86] : memref<8x6xf32, #tpu.memory_space<smem>>
    %152 = vector.broadcast %151 : f32 to vector<16x31xf32>
    %153 = arith.mulf %152, %13 : vector<16x31xf32>
    %154 = arith.addf %150, %153 : vector<16x31xf32>
    %c1_87 = arith.constant 1 : index
    %c2_88 = arith.constant 2 : index
    %155 = memref.load %arg6[%c1_87, %c2_88] : memref<8x6xf32, #tpu.memory_space<smem>>
    %156 = vector.broadcast %155 : f32 to vector<16x31xf32>
    %157 = arith.mulf %156, %18 : vector<16x31xf32>
    %158 = arith.addf %154, %157 : vector<16x31xf32>
    %c1_89 = arith.constant 1 : index
    %c3_90 = arith.constant 3 : index
    %159 = memref.load %arg6[%c1_89, %c3_90] : memref<8x6xf32, #tpu.memory_space<smem>>
    %160 = vector.broadcast %159 : f32 to vector<16x31xf32>
    %161 = arith.mulf %160, %8 : vector<16x31xf32>
    %c1_91 = arith.constant 1 : index
    %c4_92 = arith.constant 4 : index
    %162 = memref.load %arg6[%c1_91, %c4_92] : memref<8x6xf32, #tpu.memory_space<smem>>
    %163 = vector.broadcast %162 : f32 to vector<16x31xf32>
    %164 = arith.mulf %163, %13 : vector<16x31xf32>
    %165 = arith.addf %161, %164 : vector<16x31xf32>
    %c1_93 = arith.constant 1 : index
    %c5_94 = arith.constant 5 : index
    %166 = memref.load %arg6[%c1_93, %c5_94] : memref<8x6xf32, #tpu.memory_space<smem>>
    %167 = vector.broadcast %166 : f32 to vector<16x31xf32>
    %168 = arith.mulf %167, %18 : vector<16x31xf32>
    %169 = arith.addf %165, %168 : vector<16x31xf32>
    %cst_95 = arith.constant dense<0.000000e+00> : vector<16x31xf32>
    %170 = tpu.matmul %140, %158, %cst_95 {dimension_numbers = #tpu.dot_dimension_numbers<[1], [0], [0], [1], [0, 0, 1, 1], [], []>} : vector<16x16xf32>, vector<16x31xf32>, vector<16x31xf32> -> vector<16x31xf32>
    %cst_96 = arith.constant dense<0.000000e+00> : vector<16x31xf32>
    %171 = tpu.matmul %147, %169, %cst_96 {dimension_numbers = #tpu.dot_dimension_numbers<[1], [0], [0], [1], [0, 0, 1, 1], [], []>} : vector<16x16xf32>, vector<16x31xf32>, vector<16x31xf32> -> vector<16x31xf32>
    %172 = arith.addf %170, %171 : vector<16x31xf32>
    %c1_97 = arith.constant 1 : index
    %173 = memref.load %arg7[%c1_97] : memref<8xf32, #tpu.memory_space<smem>>
    %174 = vector.broadcast %173 : f32 to vector<16x31xf32>
    %175 = arith.addf %172, %174 : vector<16x31xf32>
    %c0_98 = arith.constant 0 : index
    %c1_99 = arith.constant 1 : index
    %c0_100 = arith.constant 0 : index
    %c0_101 = arith.constant 0 : index
    %176 = vector.load %arg8[%c0_98, %c1_99, %c0_100, %c0_101] : memref<1x8x16x31xf32, #tpu.memory_space<vmem>>, vector<1x1x16x31xf32>
    %177 = vector.shape_cast %176 : vector<1x1x16x31xf32> to vector<16x31xf32>
    %178 = vector.shape_cast %175 : vector<16x31xf32> to vector<1x1x16x31xf32>
    tpu.vector_store %arg8[%c0_98, %c1_99, %c0_100, %c0_101], %178 {strides = array<i32>} : memref<1x8x16x31xf32, #tpu.memory_space<vmem>>, vector<1x1x16x31xf32>,
    %c2_102 = arith.constant 2 : index
    %c0_103 = arith.constant 0 : index
    %179 = memref.load %arg4[%c2_102, %c0_103] : memref<8x4xf32, #tpu.memory_space<smem>>
    %180 = vector.broadcast %179 : f32 to vector<16x16xf32>
    %181 = arith.mulf %180, %20 : vector<16x16xf32>
    %c2_104 = arith.constant 2 : index
    %c0_105 = arith.constant 0 : index
    %182 = memref.load %arg4[%c2_104, %c0_105] : memref<8x4xf32, #tpu.memory_space<smem>>
    %183 = vector.broadcast %182 : f32 to vector<1x16xf32>
    %184 = arith.mulf %183, %28 : vector<1x16xf32>
    %c2_106 = arith.constant 2 : index
    %c1_107 = arith.constant 1 : index
    %185 = memref.load %arg4[%c2_106, %c1_107] : memref<8x4xf32, #tpu.memory_space<smem>>
    %186 = vector.broadcast %185 : f32 to vector<16x16xf32>
    %187 = arith.mulf %186, %22 : vector<16x16xf32>
    %188 = arith.addf %181, %187 : vector<16x16xf32>
    %c2_108 = arith.constant 2 : index
    %c1_109 = arith.constant 1 : index
    %189 = memref.load %arg4[%c2_108, %c1_109] : memref<8x4xf32, #tpu.memory_space<smem>>
    %190 = vector.broadcast %189 : f32 to vector<1x16xf32>
    %191 = arith.mulf %190, %30 : vector<1x16xf32>
    %192 = arith.addf %184, %191 : vector<1x16xf32>
    %c2_110 = arith.constant 2 : index
    %c2_111 = arith.constant 2 : index
    %193 = memref.load %arg4[%c2_110, %c2_111] : memref<8x4xf32, #tpu.memory_space<smem>>
    %194 = vector.broadcast %193 : f32 to vector<16x16xf32>
    %195 = arith.mulf %194, %24 : vector<16x16xf32>
    %196 = arith.addf %188, %195 : vector<16x16xf32>
    %c2_112 = arith.constant 2 : index
    %c2_113 = arith.constant 2 : index
    %197 = memref.load %arg4[%c2_112, %c2_113] : memref<8x4xf32, #tpu.memory_space<smem>>
    %198 = vector.broadcast %197 : f32 to vector<1x16xf32>
    %199 = arith.mulf %198, %32 : vector<1x16xf32>
    %200 = arith.addf %192, %199 : vector<1x16xf32>
    %c2_114 = arith.constant 2 : index
    %c3_115 = arith.constant 3 : index
    %201 = memref.load %arg4[%c2_114, %c3_115] : memref<8x4xf32, #tpu.memory_space<smem>>
    %202 = vector.broadcast %201 : f32 to vector<16x16xf32>
    %203 = arith.mulf %202, %26 : vector<16x16xf32>
    %204 = arith.addf %196, %203 : vector<16x16xf32>
    %c2_116 = arith.constant 2 : index
    %c3_117 = arith.constant 3 : index
    %205 = memref.load %arg4[%c2_116, %c3_117] : memref<8x4xf32, #tpu.memory_space<smem>>
    %206 = vector.broadcast %205 : f32 to vector<1x16xf32>
    %207 = arith.mulf %206, %34 : vector<1x16xf32>
    %208 = arith.addf %200, %207 : vector<1x16xf32>
    %c2_118 = arith.constant 2 : index
    %209 = memref.load %arg5[%c2_118] : memref<8xf32, #tpu.memory_space<smem>>
    %210 = vector.broadcast %209 : f32 to vector<16x16xf32>
    %211 = arith.addf %204, %210 : vector<16x16xf32>
    %c2_119 = arith.constant 2 : index
    %212 = memref.load %arg5[%c2_119] : memref<8xf32, #tpu.memory_space<smem>>
    %213 = vector.broadcast %212 : f32 to vector<1x16xf32>
    %214 = arith.addf %208, %213 : vector<1x16xf32>
    %215 = vector.broadcast %36 : f32 to vector<1x16xf32>
    %216 = arith.mulf %214, %215 : vector<1x16xf32>
    %217 = vector.extract_strided_slice %211 {offsets = [0, 0], sizes = [15, 16], strides = [1, 1]} : vector<16x16xf32> to vector<15x16xf32>
    %218 = tpu.concatenate %216, %217 in 0 : vector<1x16xf32>, vector<15x16xf32> -> vector<16x16xf32>
    %c2_120 = arith.constant 2 : index
    %c0_121 = arith.constant 0 : index
    %219 = memref.load %arg6[%c2_120, %c0_121] : memref<8x6xf32, #tpu.memory_space<smem>>
    %220 = vector.broadcast %219 : f32 to vector<16x31xf32>
    %221 = arith.mulf %220, %8 : vector<16x31xf32>
    %c2_122 = arith.constant 2 : index
    %c1_123 = arith.constant 1 : index
    %222 = memref.load %arg6[%c2_122, %c1_123] : memref<8x6xf32, #tpu.memory_space<smem>>
    %223 = vector.broadcast %222 : f32 to vector<16x31xf32>
    %224 = arith.mulf %223, %13 : vector<16x31xf32>
    %225 = arith.addf %221, %224 : vector<16x31xf32>
    %c2_124 = arith.constant 2 : index
    %c2_125 = arith.constant 2 : index
    %226 = memref.load %arg6[%c2_124, %c2_125] : memref<8x6xf32, #tpu.memory_space<smem>>
    %227 = vector.broadcast %226 : f32 to vector<16x31xf32>
    %228 = arith.mulf %227, %18 : vector<16x31xf32>
    %229 = arith.addf %225, %228 : vector<16x31xf32>
    %c2_126 = arith.constant 2 : index
    %c3_127 = arith.constant 3 : index
    %230 = memref.load %arg6[%c2_126, %c3_127] : memref<8x6xf32, #tpu.memory_space<smem>>
    %231 = vector.broadcast %230 : f32 to vector<16x31xf32>
    %232 = arith.mulf %231, %8 : vector<16x31xf32>
    %c2_128 = arith.constant 2 : index
    %c4_129 = arith.constant 4 : index
    %233 = memref.load %arg6[%c2_128, %c4_129] : memref<8x6xf32, #tpu.memory_space<smem>>
    %234 = vector.broadcast %233 : f32 to vector<16x31xf32>
    %235 = arith.mulf %234, %13 : vector<16x31xf32>
    %236 = arith.addf %232, %235 : vector<16x31xf32>
    %c2_130 = arith.constant 2 : index
    %c5_131 = arith.constant 5 : index
    %237 = memref.load %arg6[%c2_130, %c5_131] : memref<8x6xf32, #tpu.memory_space<smem>>
    %238 = vector.broadcast %237 : f32 to vector<16x31xf32>
    %239 = arith.mulf %238, %18 : vector<16x31xf32>
    %240 = arith.addf %236, %239 : vector<16x31xf32>
    %cst_132 = arith.constant dense<0.000000e+00> : vector<16x31xf32>
    %241 = tpu.matmul %211, %229, %cst_132 {dimension_numbers = #tpu.dot_dimension_numbers<[1], [0], [0], [1], [0, 0, 1, 1], [], []>} : vector<16x16xf32>, vector<16x31xf32>, vector<16x31xf32> -> vector<16x31xf32>
    %cst_133 = arith.constant dense<0.000000e+00> : vector<16x31xf32>
    %242 = tpu.matmul %218, %240, %cst_133 {dimension_numbers = #tpu.dot_dimension_numbers<[1], [0], [0], [1], [0, 0, 1, 1], [], []>} : vector<16x16xf32>, vector<16x31xf32>, vector<16x31xf32> -> vector<16x31xf32>
    %243 = arith.addf %241, %242 : vector<16x31xf32>
    %c2_134 = arith.constant 2 : index
    %244 = memref.load %arg7[%c2_134] : memref<8xf32, #tpu.memory_space<smem>>
    %245 = vector.broadcast %244 : f32 to vector<16x31xf32>
    %246 = arith.addf %243, %245 : vector<16x31xf32>
    %c0_135 = arith.constant 0 : index
    %c2_136 = arith.constant 2 : index
    %c0_137 = arith.constant 0 : index
    %c0_138 = arith.constant 0 : index
    %247 = vector.load %arg8[%c0_135, %c2_136, %c0_137, %c0_138] : memref<1x8x16x31xf32, #tpu.memory_space<vmem>>, vector<1x1x16x31xf32>
    %248 = vector.shape_cast %247 : vector<1x1x16x31xf32> to vector<16x31xf32>
    %249 = vector.shape_cast %246 : vector<16x31xf32> to vector<1x1x16x31xf32>
    tpu.vector_store %arg8[%c0_135, %c2_136, %c0_137, %c0_138], %249 {strides = array<i32>} : memref<1x8x16x31xf32, #tpu.memory_space<vmem>>, vector<1x1x16x31xf32>,
    %c3_139 = arith.constant 3 : index
    %c0_140 = arith.constant 0 : index
    %250 = memref.load %arg4[%c3_139, %c0_140] : memref<8x4xf32, #tpu.memory_space<smem>>
    %251 = vector.broadcast %250 : f32 to vector<16x16xf32>
    %252 = arith.mulf %251, %20 : vector<16x16xf32>
    %c3_141 = arith.constant 3 : index
    %c0_142 = arith.constant 0 : index
    %253 = memref.load %arg4[%c3_141, %c0_142] : memref<8x4xf32, #tpu.memory_space<smem>>
    %254 = vector.broadcast %253 : f32 to vector<1x16xf32>
    %255 = arith.mulf %254, %28 : vector<1x16xf32>
    %c3_143 = arith.constant 3 : index
    %c1_144 = arith.constant 1 : index
    %256 = memref.load %arg4[%c3_143, %c1_144] : memref<8x4xf32, #tpu.memory_space<smem>>
    %257 = vector.broadcast %256 : f32 to vector<16x16xf32>
    %258 = arith.mulf %257, %22 : vector<16x16xf32>
    %259 = arith.addf %252, %258 : vector<16x16xf32>
    %c3_145 = arith.constant 3 : index
    %c1_146 = arith.constant 1 : index
    %260 = memref.load %arg4[%c3_145, %c1_146] : memref<8x4xf32, #tpu.memory_space<smem>>
    %261 = vector.broadcast %260 : f32 to vector<1x16xf32>
    %262 = arith.mulf %261, %30 : vector<1x16xf32>
    %263 = arith.addf %255, %262 : vector<1x16xf32>
    %c3_147 = arith.constant 3 : index
    %c2_148 = arith.constant 2 : index
    %264 = memref.load %arg4[%c3_147, %c2_148] : memref<8x4xf32, #tpu.memory_space<smem>>
    %265 = vector.broadcast %264 : f32 to vector<16x16xf32>
    %266 = arith.mulf %265, %24 : vector<16x16xf32>
    %267 = arith.addf %259, %266 : vector<16x16xf32>
    %c3_149 = arith.constant 3 : index
    %c2_150 = arith.constant 2 : index
    %268 = memref.load %arg4[%c3_149, %c2_150] : memref<8x4xf32, #tpu.memory_space<smem>>
    %269 = vector.broadcast %268 : f32 to vector<1x16xf32>
    %270 = arith.mulf %269, %32 : vector<1x16xf32>
    %271 = arith.addf %263, %270 : vector<1x16xf32>
    %c3_151 = arith.constant 3 : index
    %c3_152 = arith.constant 3 : index
    %272 = memref.load %arg4[%c3_151, %c3_152] : memref<8x4xf32, #tpu.memory_space<smem>>
    %273 = vector.broadcast %272 : f32 to vector<16x16xf32>
    %274 = arith.mulf %273, %26 : vector<16x16xf32>
    %275 = arith.addf %267, %274 : vector<16x16xf32>
    %c3_153 = arith.constant 3 : index
    %c3_154 = arith.constant 3 : index
    %276 = memref.load %arg4[%c3_153, %c3_154] : memref<8x4xf32, #tpu.memory_space<smem>>
    %277 = vector.broadcast %276 : f32 to vector<1x16xf32>
    %278 = arith.mulf %277, %34 : vector<1x16xf32>
    %279 = arith.addf %271, %278 : vector<1x16xf32>
    %c3_155 = arith.constant 3 : index
    %280 = memref.load %arg5[%c3_155] : memref<8xf32, #tpu.memory_space<smem>>
    %281 = vector.broadcast %280 : f32 to vector<16x16xf32>
    %282 = arith.addf %275, %281 : vector<16x16xf32>
    %c3_156 = arith.constant 3 : index
    %283 = memref.load %arg5[%c3_156] : memref<8xf32, #tpu.memory_space<smem>>
    %284 = vector.broadcast %283 : f32 to vector<1x16xf32>
    %285 = arith.addf %279, %284 : vector<1x16xf32>
    %286 = vector.broadcast %36 : f32 to vector<1x16xf32>
    %287 = arith.mulf %285, %286 : vector<1x16xf32>
    %288 = vector.extract_strided_slice %282 {offsets = [0, 0], sizes = [15, 16], strides = [1, 1]} : vector<16x16xf32> to vector<15x16xf32>
    %289 = tpu.concatenate %287, %288 in 0 : vector<1x16xf32>, vector<15x16xf32> -> vector<16x16xf32>
    %c3_157 = arith.constant 3 : index
    %c0_158 = arith.constant 0 : index
    %290 = memref.load %arg6[%c3_157, %c0_158] : memref<8x6xf32, #tpu.memory_space<smem>>
    %291 = vector.broadcast %290 : f32 to vector<16x31xf32>
    %292 = arith.mulf %291, %8 : vector<16x31xf32>
    %c3_159 = arith.constant 3 : index
    %c1_160 = arith.constant 1 : index
    %293 = memref.load %arg6[%c3_159, %c1_160] : memref<8x6xf32, #tpu.memory_space<smem>>
    %294 = vector.broadcast %293 : f32 to vector<16x31xf32>
    %295 = arith.mulf %294, %13 : vector<16x31xf32>
    %296 = arith.addf %292, %295 : vector<16x31xf32>
    %c3_161 = arith.constant 3 : index
    %c2_162 = arith.constant 2 : index
    %297 = memref.load %arg6[%c3_161, %c2_162] : memref<8x6xf32, #tpu.memory_space<smem>>
    %298 = vector.broadcast %297 : f32 to vector<16x31xf32>
    %299 = arith.mulf %298, %18 : vector<16x31xf32>
    %300 = arith.addf %296, %299 : vector<16x31xf32>
    %c3_163 = arith.constant 3 : index
    %c3_164 = arith.constant 3 : index
    %301 = memref.load %arg6[%c3_163, %c3_164] : memref<8x6xf32, #tpu.memory_space<smem>>
    %302 = vector.broadcast %301 : f32 to vector<16x31xf32>
    %303 = arith.mulf %302, %8 : vector<16x31xf32>
    %c3_165 = arith.constant 3 : index
    %c4_166 = arith.constant 4 : index
    %304 = memref.load %arg6[%c3_165, %c4_166] : memref<8x6xf32, #tpu.memory_space<smem>>
    %305 = vector.broadcast %304 : f32 to vector<16x31xf32>
    %306 = arith.mulf %305, %13 : vector<16x31xf32>
    %307 = arith.addf %303, %306 : vector<16x31xf32>
    %c3_167 = arith.constant 3 : index
    %c5_168 = arith.constant 5 : index
    %308 = memref.load %arg6[%c3_167, %c5_168] : memref<8x6xf32, #tpu.memory_space<smem>>
    %309 = vector.broadcast %308 : f32 to vector<16x31xf32>
    %310 = arith.mulf %309, %18 : vector<16x31xf32>
    %311 = arith.addf %307, %310 : vector<16x31xf32>
    %cst_169 = arith.constant dense<0.000000e+00> : vector<16x31xf32>
    %312 = tpu.matmul %282, %300, %cst_169 {dimension_numbers = #tpu.dot_dimension_numbers<[1], [0], [0], [1], [0, 0, 1, 1], [], []>} : vector<16x16xf32>, vector<16x31xf32>, vector<16x31xf32> -> vector<16x31xf32>
    %cst_170 = arith.constant dense<0.000000e+00> : vector<16x31xf32>
    %313 = tpu.matmul %289, %311, %cst_170 {dimension_numbers = #tpu.dot_dimension_numbers<[1], [0], [0], [1], [0, 0, 1, 1], [], []>} : vector<16x16xf32>, vector<16x31xf32>, vector<16x31xf32> -> vector<16x31xf32>
    %314 = arith.addf %312, %313 : vector<16x31xf32>
    %c3_171 = arith.constant 3 : index
    %315 = memref.load %arg7[%c3_171] : memref<8xf32, #tpu.memory_space<smem>>
    %316 = vector.broadcast %315 : f32 to vector<16x31xf32>
    %317 = arith.addf %314, %316 : vector<16x31xf32>
    %c0_172 = arith.constant 0 : index
    %c3_173 = arith.constant 3 : index
    %c0_174 = arith.constant 0 : index
    %c0_175 = arith.constant 0 : index
    %318 = vector.load %arg8[%c0_172, %c3_173, %c0_174, %c0_175] : memref<1x8x16x31xf32, #tpu.memory_space<vmem>>, vector<1x1x16x31xf32>
    %319 = vector.shape_cast %318 : vector<1x1x16x31xf32> to vector<16x31xf32>
    %320 = vector.shape_cast %317 : vector<16x31xf32> to vector<1x1x16x31xf32>
    tpu.vector_store %arg8[%c0_172, %c3_173, %c0_174, %c0_175], %320 {strides = array<i32>} : memref<1x8x16x31xf32, #tpu.memory_space<vmem>>, vector<1x1x16x31xf32>,
    %c4_176 = arith.constant 4 : index
    %c0_177 = arith.constant 0 : index
    %321 = memref.load %arg4[%c4_176, %c0_177] : memref<8x4xf32, #tpu.memory_space<smem>>
    %322 = vector.broadcast %321 : f32 to vector<16x16xf32>
    %323 = arith.mulf %322, %20 : vector<16x16xf32>
    %c4_178 = arith.constant 4 : index
    %c0_179 = arith.constant 0 : index
    %324 = memref.load %arg4[%c4_178, %c0_179] : memref<8x4xf32, #tpu.memory_space<smem>>
    %325 = vector.broadcast %324 : f32 to vector<1x16xf32>
    %326 = arith.mulf %325, %28 : vector<1x16xf32>
    %c4_180 = arith.constant 4 : index
    %c1_181 = arith.constant 1 : index
    %327 = memref.load %arg4[%c4_180, %c1_181] : memref<8x4xf32, #tpu.memory_space<smem>>
    %328 = vector.broadcast %327 : f32 to vector<16x16xf32>
    %329 = arith.mulf %328, %22 : vector<16x16xf32>
    %330 = arith.addf %323, %329 : vector<16x16xf32>
    %c4_182 = arith.constant 4 : index
    %c1_183 = arith.constant 1 : index
    %331 = memref.load %arg4[%c4_182, %c1_183] : memref<8x4xf32, #tpu.memory_space<smem>>
    %332 = vector.broadcast %331 : f32 to vector<1x16xf32>
    %333 = arith.mulf %332, %30 : vector<1x16xf32>
    %334 = arith.addf %326, %333 : vector<1x16xf32>
    %c4_184 = arith.constant 4 : index
    %c2_185 = arith.constant 2 : index
    %335 = memref.load %arg4[%c4_184, %c2_185] : memref<8x4xf32, #tpu.memory_space<smem>>
    %336 = vector.broadcast %335 : f32 to vector<16x16xf32>
    %337 = arith.mulf %336, %24 : vector<16x16xf32>
    %338 = arith.addf %330, %337 : vector<16x16xf32>
    %c4_186 = arith.constant 4 : index
    %c2_187 = arith.constant 2 : index
    %339 = memref.load %arg4[%c4_186, %c2_187] : memref<8x4xf32, #tpu.memory_space<smem>>
    %340 = vector.broadcast %339 : f32 to vector<1x16xf32>
    %341 = arith.mulf %340, %32 : vector<1x16xf32>
    %342 = arith.addf %334, %341 : vector<1x16xf32>
    %c4_188 = arith.constant 4 : index
    %c3_189 = arith.constant 3 : index
    %343 = memref.load %arg4[%c4_188, %c3_189] : memref<8x4xf32, #tpu.memory_space<smem>>
    %344 = vector.broadcast %343 : f32 to vector<16x16xf32>
    %345 = arith.mulf %344, %26 : vector<16x16xf32>
    %346 = arith.addf %338, %345 : vector<16x16xf32>
    %c4_190 = arith.constant 4 : index
    %c3_191 = arith.constant 3 : index
    %347 = memref.load %arg4[%c4_190, %c3_191] : memref<8x4xf32, #tpu.memory_space<smem>>
    %348 = vector.broadcast %347 : f32 to vector<1x16xf32>
    %349 = arith.mulf %348, %34 : vector<1x16xf32>
    %350 = arith.addf %342, %349 : vector<1x16xf32>
    %c4_192 = arith.constant 4 : index
    %351 = memref.load %arg5[%c4_192] : memref<8xf32, #tpu.memory_space<smem>>
    %352 = vector.broadcast %351 : f32 to vector<16x16xf32>
    %353 = arith.addf %346, %352 : vector<16x16xf32>
    %c4_193 = arith.constant 4 : index
    %354 = memref.load %arg5[%c4_193] : memref<8xf32, #tpu.memory_space<smem>>
    %355 = vector.broadcast %354 : f32 to vector<1x16xf32>
    %356 = arith.addf %350, %355 : vector<1x16xf32>
    %357 = vector.broadcast %36 : f32 to vector<1x16xf32>
    %358 = arith.mulf %356, %357 : vector<1x16xf32>
    %359 = vector.extract_strided_slice %353 {offsets = [0, 0], sizes = [15, 16], strides = [1, 1]} : vector<16x16xf32> to vector<15x16xf32>
    %360 = tpu.concatenate %358, %359 in 0 : vector<1x16xf32>, vector<15x16xf32> -> vector<16x16xf32>
    %c4_194 = arith.constant 4 : index
    %c0_195 = arith.constant 0 : index
    %361 = memref.load %arg6[%c4_194, %c0_195] : memref<8x6xf32, #tpu.memory_space<smem>>
    %362 = vector.broadcast %361 : f32 to vector<16x31xf32>
    %363 = arith.mulf %362, %8 : vector<16x31xf32>
    %c4_196 = arith.constant 4 : index
    %c1_197 = arith.constant 1 : index
    %364 = memref.load %arg6[%c4_196, %c1_197] : memref<8x6xf32, #tpu.memory_space<smem>>
    %365 = vector.broadcast %364 : f32 to vector<16x31xf32>
    %366 = arith.mulf %365, %13 : vector<16x31xf32>
    %367 = arith.addf %363, %366 : vector<16x31xf32>
    %c4_198 = arith.constant 4 : index
    %c2_199 = arith.constant 2 : index
    %368 = memref.load %arg6[%c4_198, %c2_199] : memref<8x6xf32, #tpu.memory_space<smem>>
    %369 = vector.broadcast %368 : f32 to vector<16x31xf32>
    %370 = arith.mulf %369, %18 : vector<16x31xf32>
    %371 = arith.addf %367, %370 : vector<16x31xf32>
    %c4_200 = arith.constant 4 : index
    %c3_201 = arith.constant 3 : index
    %372 = memref.load %arg6[%c4_200, %c3_201] : memref<8x6xf32, #tpu.memory_space<smem>>
    %373 = vector.broadcast %372 : f32 to vector<16x31xf32>
    %374 = arith.mulf %373, %8 : vector<16x31xf32>
    %c4_202 = arith.constant 4 : index
    %c4_203 = arith.constant 4 : index
    %375 = memref.load %arg6[%c4_202, %c4_203] : memref<8x6xf32, #tpu.memory_space<smem>>
    %376 = vector.broadcast %375 : f32 to vector<16x31xf32>
    %377 = arith.mulf %376, %13 : vector<16x31xf32>
    %378 = arith.addf %374, %377 : vector<16x31xf32>
    %c4_204 = arith.constant 4 : index
    %c5_205 = arith.constant 5 : index
    %379 = memref.load %arg6[%c4_204, %c5_205] : memref<8x6xf32, #tpu.memory_space<smem>>
    %380 = vector.broadcast %379 : f32 to vector<16x31xf32>
    %381 = arith.mulf %380, %18 : vector<16x31xf32>
    %382 = arith.addf %378, %381 : vector<16x31xf32>
    %cst_206 = arith.constant dense<0.000000e+00> : vector<16x31xf32>
    %383 = tpu.matmul %353, %371, %cst_206 {dimension_numbers = #tpu.dot_dimension_numbers<[1], [0], [0], [1], [0, 0, 1, 1], [], []>} : vector<16x16xf32>, vector<16x31xf32>, vector<16x31xf32> -> vector<16x31xf32>
    %cst_207 = arith.constant dense<0.000000e+00> : vector<16x31xf32>
    %384 = tpu.matmul %360, %382, %cst_207 {dimension_numbers = #tpu.dot_dimension_numbers<[1], [0], [0], [1], [0, 0, 1, 1], [], []>} : vector<16x16xf32>, vector<16x31xf32>, vector<16x31xf32> -> vector<16x31xf32>
    %385 = arith.addf %383, %384 : vector<16x31xf32>
    %c4_208 = arith.constant 4 : index
    %386 = memref.load %arg7[%c4_208] : memref<8xf32, #tpu.memory_space<smem>>
    %387 = vector.broadcast %386 : f32 to vector<16x31xf32>
    %388 = arith.addf %385, %387 : vector<16x31xf32>
    %c0_209 = arith.constant 0 : index
    %c4_210 = arith.constant 4 : index
    %c0_211 = arith.constant 0 : index
    %c0_212 = arith.constant 0 : index
    %389 = vector.load %arg8[%c0_209, %c4_210, %c0_211, %c0_212] : memref<1x8x16x31xf32, #tpu.memory_space<vmem>>, vector<1x1x16x31xf32>
    %390 = vector.shape_cast %389 : vector<1x1x16x31xf32> to vector<16x31xf32>
    %391 = vector.shape_cast %388 : vector<16x31xf32> to vector<1x1x16x31xf32>
    tpu.vector_store %arg8[%c0_209, %c4_210, %c0_211, %c0_212], %391 {strides = array<i32>} : memref<1x8x16x31xf32, #tpu.memory_space<vmem>>, vector<1x1x16x31xf32>,
    %c5_213 = arith.constant 5 : index
    %c0_214 = arith.constant 0 : index
    %392 = memref.load %arg4[%c5_213, %c0_214] : memref<8x4xf32, #tpu.memory_space<smem>>
    %393 = vector.broadcast %392 : f32 to vector<16x16xf32>
    %394 = arith.mulf %393, %20 : vector<16x16xf32>
    %c5_215 = arith.constant 5 : index
    %c0_216 = arith.constant 0 : index
    %395 = memref.load %arg4[%c5_215, %c0_216] : memref<8x4xf32, #tpu.memory_space<smem>>
    %396 = vector.broadcast %395 : f32 to vector<1x16xf32>
    %397 = arith.mulf %396, %28 : vector<1x16xf32>
    %c5_217 = arith.constant 5 : index
    %c1_218 = arith.constant 1 : index
    %398 = memref.load %arg4[%c5_217, %c1_218] : memref<8x4xf32, #tpu.memory_space<smem>>
    %399 = vector.broadcast %398 : f32 to vector<16x16xf32>
    %400 = arith.mulf %399, %22 : vector<16x16xf32>
    %401 = arith.addf %394, %400 : vector<16x16xf32>
    %c5_219 = arith.constant 5 : index
    %c1_220 = arith.constant 1 : index
    %402 = memref.load %arg4[%c5_219, %c1_220] : memref<8x4xf32, #tpu.memory_space<smem>>
    %403 = vector.broadcast %402 : f32 to vector<1x16xf32>
    %404 = arith.mulf %403, %30 : vector<1x16xf32>
    %405 = arith.addf %397, %404 : vector<1x16xf32>
    %c5_221 = arith.constant 5 : index
    %c2_222 = arith.constant 2 : index
    %406 = memref.load %arg4[%c5_221, %c2_222] : memref<8x4xf32, #tpu.memory_space<smem>>
    %407 = vector.broadcast %406 : f32 to vector<16x16xf32>
    %408 = arith.mulf %407, %24 : vector<16x16xf32>
    %409 = arith.addf %401, %408 : vector<16x16xf32>
    %c5_223 = arith.constant 5 : index
    %c2_224 = arith.constant 2 : index
    %410 = memref.load %arg4[%c5_223, %c2_224] : memref<8x4xf32, #tpu.memory_space<smem>>
    %411 = vector.broadcast %410 : f32 to vector<1x16xf32>
    %412 = arith.mulf %411, %32 : vector<1x16xf32>
    %413 = arith.addf %405, %412 : vector<1x16xf32>
    %c5_225 = arith.constant 5 : index
    %c3_226 = arith.constant 3 : index
    %414 = memref.load %arg4[%c5_225, %c3_226] : memref<8x4xf32, #tpu.memory_space<smem>>
    %415 = vector.broadcast %414 : f32 to vector<16x16xf32>
    %416 = arith.mulf %415, %26 : vector<16x16xf32>
    %417 = arith.addf %409, %416 : vector<16x16xf32>
    %c5_227 = arith.constant 5 : index
    %c3_228 = arith.constant 3 : index
    %418 = memref.load %arg4[%c5_227, %c3_228] : memref<8x4xf32, #tpu.memory_space<smem>>
    %419 = vector.broadcast %418 : f32 to vector<1x16xf32>
    %420 = arith.mulf %419, %34 : vector<1x16xf32>
    %421 = arith.addf %413, %420 : vector<1x16xf32>
    %c5_229 = arith.constant 5 : index
    %422 = memref.load %arg5[%c5_229] : memref<8xf32, #tpu.memory_space<smem>>
    %423 = vector.broadcast %422 : f32 to vector<16x16xf32>
    %424 = arith.addf %417, %423 : vector<16x16xf32>
    %c5_230 = arith.constant 5 : index
    %425 = memref.load %arg5[%c5_230] : memref<8xf32, #tpu.memory_space<smem>>
    %426 = vector.broadcast %425 : f32 to vector<1x16xf32>
    %427 = arith.addf %421, %426 : vector<1x16xf32>
    %428 = vector.broadcast %36 : f32 to vector<1x16xf32>
    %429 = arith.mulf %427, %428 : vector<1x16xf32>
    %430 = vector.extract_strided_slice %424 {offsets = [0, 0], sizes = [15, 16], strides = [1, 1]} : vector<16x16xf32> to vector<15x16xf32>
    %431 = tpu.concatenate %429, %430 in 0 : vector<1x16xf32>, vector<15x16xf32> -> vector<16x16xf32>
    %c5_231 = arith.constant 5 : index
    %c0_232 = arith.constant 0 : index
    %432 = memref.load %arg6[%c5_231, %c0_232] : memref<8x6xf32, #tpu.memory_space<smem>>
    %433 = vector.broadcast %432 : f32 to vector<16x31xf32>
    %434 = arith.mulf %433, %8 : vector<16x31xf32>
    %c5_233 = arith.constant 5 : index
    %c1_234 = arith.constant 1 : index
    %435 = memref.load %arg6[%c5_233, %c1_234] : memref<8x6xf32, #tpu.memory_space<smem>>
    %436 = vector.broadcast %435 : f32 to vector<16x31xf32>
    %437 = arith.mulf %436, %13 : vector<16x31xf32>
    %438 = arith.addf %434, %437 : vector<16x31xf32>
    %c5_235 = arith.constant 5 : index
    %c2_236 = arith.constant 2 : index
    %439 = memref.load %arg6[%c5_235, %c2_236] : memref<8x6xf32, #tpu.memory_space<smem>>
    %440 = vector.broadcast %439 : f32 to vector<16x31xf32>
    %441 = arith.mulf %440, %18 : vector<16x31xf32>
    %442 = arith.addf %438, %441 : vector<16x31xf32>
    %c5_237 = arith.constant 5 : index
    %c3_238 = arith.constant 3 : index
    %443 = memref.load %arg6[%c5_237, %c3_238] : memref<8x6xf32, #tpu.memory_space<smem>>
    %444 = vector.broadcast %443 : f32 to vector<16x31xf32>
    %445 = arith.mulf %444, %8 : vector<16x31xf32>
    %c5_239 = arith.constant 5 : index
    %c4_240 = arith.constant 4 : index
    %446 = memref.load %arg6[%c5_239, %c4_240] : memref<8x6xf32, #tpu.memory_space<smem>>
    %447 = vector.broadcast %446 : f32 to vector<16x31xf32>
    %448 = arith.mulf %447, %13 : vector<16x31xf32>
    %449 = arith.addf %445, %448 : vector<16x31xf32>
    %c5_241 = arith.constant 5 : index
    %c5_242 = arith.constant 5 : index
    %450 = memref.load %arg6[%c5_241, %c5_242] : memref<8x6xf32, #tpu.memory_space<smem>>
    %451 = vector.broadcast %450 : f32 to vector<16x31xf32>
    %452 = arith.mulf %451, %18 : vector<16x31xf32>
    %453 = arith.addf %449, %452 : vector<16x31xf32>
    %cst_243 = arith.constant dense<0.000000e+00> : vector<16x31xf32>
    %454 = tpu.matmul %424, %442, %cst_243 {dimension_numbers = #tpu.dot_dimension_numbers<[1], [0], [0], [1], [0, 0, 1, 1], [], []>} : vector<16x16xf32>, vector<16x31xf32>, vector<16x31xf32> -> vector<16x31xf32>
    %cst_244 = arith.constant dense<0.000000e+00> : vector<16x31xf32>
    %455 = tpu.matmul %431, %453, %cst_244 {dimension_numbers = #tpu.dot_dimension_numbers<[1], [0], [0], [1], [0, 0, 1, 1], [], []>} : vector<16x16xf32>, vector<16x31xf32>, vector<16x31xf32> -> vector<16x31xf32>
    %456 = arith.addf %454, %455 : vector<16x31xf32>
    %c5_245 = arith.constant 5 : index
    %457 = memref.load %arg7[%c5_245] : memref<8xf32, #tpu.memory_space<smem>>
    %458 = vector.broadcast %457 : f32 to vector<16x31xf32>
    %459 = arith.addf %456, %458 : vector<16x31xf32>
    %c0_246 = arith.constant 0 : index
    %c5_247 = arith.constant 5 : index
    %c0_248 = arith.constant 0 : index
    %c0_249 = arith.constant 0 : index
    %460 = vector.load %arg8[%c0_246, %c5_247, %c0_248, %c0_249] : memref<1x8x16x31xf32, #tpu.memory_space<vmem>>, vector<1x1x16x31xf32>
    %461 = vector.shape_cast %460 : vector<1x1x16x31xf32> to vector<16x31xf32>
    %462 = vector.shape_cast %459 : vector<16x31xf32> to vector<1x1x16x31xf32>
    tpu.vector_store %arg8[%c0_246, %c5_247, %c0_248, %c0_249], %462 {strides = array<i32>} : memref<1x8x16x31xf32, #tpu.memory_space<vmem>>, vector<1x1x16x31xf32>,
    %c6 = arith.constant 6 : index
    %c0_250 = arith.constant 0 : index
    %463 = memref.load %arg4[%c6, %c0_250] : memref<8x4xf32, #tpu.memory_space<smem>>
    %464 = vector.broadcast %463 : f32 to vector<16x16xf32>
    %465 = arith.mulf %464, %20 : vector<16x16xf32>
    %c6_251 = arith.constant 6 : index
    %c0_252 = arith.constant 0 : index
    %466 = memref.load %arg4[%c6_251, %c0_252] : memref<8x4xf32, #tpu.memory_space<smem>>
    %467 = vector.broadcast %466 : f32 to vector<1x16xf32>
    %468 = arith.mulf %467, %28 : vector<1x16xf32>
    %c6_253 = arith.constant 6 : index
    %c1_254 = arith.constant 1 : index
    %469 = memref.load %arg4[%c6_253, %c1_254] : memref<8x4xf32, #tpu.memory_space<smem>>
    %470 = vector.broadcast %469 : f32 to vector<16x16xf32>
    %471 = arith.mulf %470, %22 : vector<16x16xf32>
    %472 = arith.addf %465, %471 : vector<16x16xf32>
    %c6_255 = arith.constant 6 : index
    %c1_256 = arith.constant 1 : index
    %473 = memref.load %arg4[%c6_255, %c1_256] : memref<8x4xf32, #tpu.memory_space<smem>>
    %474 = vector.broadcast %473 : f32 to vector<1x16xf32>
    %475 = arith.mulf %474, %30 : vector<1x16xf32>
    %476 = arith.addf %468, %475 : vector<1x16xf32>
    %c6_257 = arith.constant 6 : index
    %c2_258 = arith.constant 2 : index
    %477 = memref.load %arg4[%c6_257, %c2_258] : memref<8x4xf32, #tpu.memory_space<smem>>
    %478 = vector.broadcast %477 : f32 to vector<16x16xf32>
    %479 = arith.mulf %478, %24 : vector<16x16xf32>
    %480 = arith.addf %472, %479 : vector<16x16xf32>
    %c6_259 = arith.constant 6 : index
    %c2_260 = arith.constant 2 : index
    %481 = memref.load %arg4[%c6_259, %c2_260] : memref<8x4xf32, #tpu.memory_space<smem>>
    %482 = vector.broadcast %481 : f32 to vector<1x16xf32>
    %483 = arith.mulf %482, %32 : vector<1x16xf32>
    %484 = arith.addf %476, %483 : vector<1x16xf32>
    %c6_261 = arith.constant 6 : index
    %c3_262 = arith.constant 3 : index
    %485 = memref.load %arg4[%c6_261, %c3_262] : memref<8x4xf32, #tpu.memory_space<smem>>
    %486 = vector.broadcast %485 : f32 to vector<16x16xf32>
    %487 = arith.mulf %486, %26 : vector<16x16xf32>
    %488 = arith.addf %480, %487 : vector<16x16xf32>
    %c6_263 = arith.constant 6 : index
    %c3_264 = arith.constant 3 : index
    %489 = memref.load %arg4[%c6_263, %c3_264] : memref<8x4xf32, #tpu.memory_space<smem>>
    %490 = vector.broadcast %489 : f32 to vector<1x16xf32>
    %491 = arith.mulf %490, %34 : vector<1x16xf32>
    %492 = arith.addf %484, %491 : vector<1x16xf32>
    %c6_265 = arith.constant 6 : index
    %493 = memref.load %arg5[%c6_265] : memref<8xf32, #tpu.memory_space<smem>>
    %494 = vector.broadcast %493 : f32 to vector<16x16xf32>
    %495 = arith.addf %488, %494 : vector<16x16xf32>
    %c6_266 = arith.constant 6 : index
    %496 = memref.load %arg5[%c6_266] : memref<8xf32, #tpu.memory_space<smem>>
    %497 = vector.broadcast %496 : f32 to vector<1x16xf32>
    %498 = arith.addf %492, %497 : vector<1x16xf32>
    %499 = vector.broadcast %36 : f32 to vector<1x16xf32>
    %500 = arith.mulf %498, %499 : vector<1x16xf32>
    %501 = vector.extract_strided_slice %495 {offsets = [0, 0], sizes = [15, 16], strides = [1, 1]} : vector<16x16xf32> to vector<15x16xf32>
    %502 = tpu.concatenate %500, %501 in 0 : vector<1x16xf32>, vector<15x16xf32> -> vector<16x16xf32>
    %c6_267 = arith.constant 6 : index
    %c0_268 = arith.constant 0 : index
    %503 = memref.load %arg6[%c6_267, %c0_268] : memref<8x6xf32, #tpu.memory_space<smem>>
    %504 = vector.broadcast %503 : f32 to vector<16x31xf32>
    %505 = arith.mulf %504, %8 : vector<16x31xf32>
    %c6_269 = arith.constant 6 : index
    %c1_270 = arith.constant 1 : index
    %506 = memref.load %arg6[%c6_269, %c1_270] : memref<8x6xf32, #tpu.memory_space<smem>>
    %507 = vector.broadcast %506 : f32 to vector<16x31xf32>
    %508 = arith.mulf %507, %13 : vector<16x31xf32>
    %509 = arith.addf %505, %508 : vector<16x31xf32>
    %c6_271 = arith.constant 6 : index
    %c2_272 = arith.constant 2 : index
    %510 = memref.load %arg6[%c6_271, %c2_272] : memref<8x6xf32, #tpu.memory_space<smem>>
    %511 = vector.broadcast %510 : f32 to vector<16x31xf32>
    %512 = arith.mulf %511, %18 : vector<16x31xf32>
    %513 = arith.addf %509, %512 : vector<16x31xf32>
    %c6_273 = arith.constant 6 : index
    %c3_274 = arith.constant 3 : index
    %514 = memref.load %arg6[%c6_273, %c3_274] : memref<8x6xf32, #tpu.memory_space<smem>>
    %515 = vector.broadcast %514 : f32 to vector<16x31xf32>
    %516 = arith.mulf %515, %8 : vector<16x31xf32>
    %c6_275 = arith.constant 6 : index
    %c4_276 = arith.constant 4 : index
    %517 = memref.load %arg6[%c6_275, %c4_276] : memref<8x6xf32, #tpu.memory_space<smem>>
    %518 = vector.broadcast %517 : f32 to vector<16x31xf32>
    %519 = arith.mulf %518, %13 : vector<16x31xf32>
    %520 = arith.addf %516, %519 : vector<16x31xf32>
    %c6_277 = arith.constant 6 : index
    %c5_278 = arith.constant 5 : index
    %521 = memref.load %arg6[%c6_277, %c5_278] : memref<8x6xf32, #tpu.memory_space<smem>>
    %522 = vector.broadcast %521 : f32 to vector<16x31xf32>
    %523 = arith.mulf %522, %18 : vector<16x31xf32>
    %524 = arith.addf %520, %523 : vector<16x31xf32>
    %cst_279 = arith.constant dense<0.000000e+00> : vector<16x31xf32>
    %525 = tpu.matmul %495, %513, %cst_279 {dimension_numbers = #tpu.dot_dimension_numbers<[1], [0], [0], [1], [0, 0, 1, 1], [], []>} : vector<16x16xf32>, vector<16x31xf32>, vector<16x31xf32> -> vector<16x31xf32>
    %cst_280 = arith.constant dense<0.000000e+00> : vector<16x31xf32>
    %526 = tpu.matmul %502, %524, %cst_280 {dimension_numbers = #tpu.dot_dimension_numbers<[1], [0], [0], [1], [0, 0, 1, 1], [], []>} : vector<16x16xf32>, vector<16x31xf32>, vector<16x31xf32> -> vector<16x31xf32>
    %527 = arith.addf %525, %526 : vector<16x31xf32>
    %c6_281 = arith.constant 6 : index
    %528 = memref.load %arg7[%c6_281] : memref<8xf32, #tpu.memory_space<smem>>
    %529 = vector.broadcast %528 : f32 to vector<16x31xf32>
    %530 = arith.addf %527, %529 : vector<16x31xf32>
    %c0_282 = arith.constant 0 : index
    %c6_283 = arith.constant 6 : index
    %c0_284 = arith.constant 0 : index
    %c0_285 = arith.constant 0 : index
    %531 = vector.load %arg8[%c0_282, %c6_283, %c0_284, %c0_285] : memref<1x8x16x31xf32, #tpu.memory_space<vmem>>, vector<1x1x16x31xf32>
    %532 = vector.shape_cast %531 : vector<1x1x16x31xf32> to vector<16x31xf32>
    %533 = vector.shape_cast %530 : vector<16x31xf32> to vector<1x1x16x31xf32>
    tpu.vector_store %arg8[%c0_282, %c6_283, %c0_284, %c0_285], %533 {strides = array<i32>} : memref<1x8x16x31xf32, #tpu.memory_space<vmem>>, vector<1x1x16x31xf32>,
    %c7_286 = arith.constant 7 : index
    %c0_287 = arith.constant 0 : index
    %534 = memref.load %arg4[%c7_286, %c0_287] : memref<8x4xf32, #tpu.memory_space<smem>>
    %535 = vector.broadcast %534 : f32 to vector<16x16xf32>
    %536 = arith.mulf %535, %20 : vector<16x16xf32>
    %c7_288 = arith.constant 7 : index
    %c0_289 = arith.constant 0 : index
    %537 = memref.load %arg4[%c7_288, %c0_289] : memref<8x4xf32, #tpu.memory_space<smem>>
    %538 = vector.broadcast %537 : f32 to vector<1x16xf32>
    %539 = arith.mulf %538, %28 : vector<1x16xf32>
    %c7_290 = arith.constant 7 : index
    %c1_291 = arith.constant 1 : index
    %540 = memref.load %arg4[%c7_290, %c1_291] : memref<8x4xf32, #tpu.memory_space<smem>>
    %541 = vector.broadcast %540 : f32 to vector<16x16xf32>
    %542 = arith.mulf %541, %22 : vector<16x16xf32>
    %543 = arith.addf %536, %542 : vector<16x16xf32>
    %c7_292 = arith.constant 7 : index
    %c1_293 = arith.constant 1 : index
    %544 = memref.load %arg4[%c7_292, %c1_293] : memref<8x4xf32, #tpu.memory_space<smem>>
    %545 = vector.broadcast %544 : f32 to vector<1x16xf32>
    %546 = arith.mulf %545, %30 : vector<1x16xf32>
    %547 = arith.addf %539, %546 : vector<1x16xf32>
    %c7_294 = arith.constant 7 : index
    %c2_295 = arith.constant 2 : index
    %548 = memref.load %arg4[%c7_294, %c2_295] : memref<8x4xf32, #tpu.memory_space<smem>>
    %549 = vector.broadcast %548 : f32 to vector<16x16xf32>
    %550 = arith.mulf %549, %24 : vector<16x16xf32>
    %551 = arith.addf %543, %550 : vector<16x16xf32>
    %c7_296 = arith.constant 7 : index
    %c2_297 = arith.constant 2 : index
    %552 = memref.load %arg4[%c7_296, %c2_297] : memref<8x4xf32, #tpu.memory_space<smem>>
    %553 = vector.broadcast %552 : f32 to vector<1x16xf32>
    %554 = arith.mulf %553, %32 : vector<1x16xf32>
    %555 = arith.addf %547, %554 : vector<1x16xf32>
    %c7_298 = arith.constant 7 : index
    %c3_299 = arith.constant 3 : index
    %556 = memref.load %arg4[%c7_298, %c3_299] : memref<8x4xf32, #tpu.memory_space<smem>>
    %557 = vector.broadcast %556 : f32 to vector<16x16xf32>
    %558 = arith.mulf %557, %26 : vector<16x16xf32>
    %559 = arith.addf %551, %558 : vector<16x16xf32>
    %c7_300 = arith.constant 7 : index
    %c3_301 = arith.constant 3 : index
    %560 = memref.load %arg4[%c7_300, %c3_301] : memref<8x4xf32, #tpu.memory_space<smem>>
    %561 = vector.broadcast %560 : f32 to vector<1x16xf32>
    %562 = arith.mulf %561, %34 : vector<1x16xf32>
    %563 = arith.addf %555, %562 : vector<1x16xf32>
    %c7_302 = arith.constant 7 : index
    %564 = memref.load %arg5[%c7_302] : memref<8xf32, #tpu.memory_space<smem>>
    %565 = vector.broadcast %564 : f32 to vector<16x16xf32>
    %566 = arith.addf %559, %565 : vector<16x16xf32>
    %c7_303 = arith.constant 7 : index
    %567 = memref.load %arg5[%c7_303] : memref<8xf32, #tpu.memory_space<smem>>
    %568 = vector.broadcast %567 : f32 to vector<1x16xf32>
    %569 = arith.addf %563, %568 : vector<1x16xf32>
    %570 = vector.broadcast %36 : f32 to vector<1x16xf32>
    %571 = arith.mulf %569, %570 : vector<1x16xf32>
    %572 = vector.extract_strided_slice %566 {offsets = [0, 0], sizes = [15, 16], strides = [1, 1]} : vector<16x16xf32> to vector<15x16xf32>
    %573 = tpu.concatenate %571, %572 in 0 : vector<1x16xf32>, vector<15x16xf32> -> vector<16x16xf32>
    %c7_304 = arith.constant 7 : index
    %c0_305 = arith.constant 0 : index
    %574 = memref.load %arg6[%c7_304, %c0_305] : memref<8x6xf32, #tpu.memory_space<smem>>
    %575 = vector.broadcast %574 : f32 to vector<16x31xf32>
    %576 = arith.mulf %575, %8 : vector<16x31xf32>
    %c7_306 = arith.constant 7 : index
    %c1_307 = arith.constant 1 : index
    %577 = memref.load %arg6[%c7_306, %c1_307] : memref<8x6xf32, #tpu.memory_space<smem>>
    %578 = vector.broadcast %577 : f32 to vector<16x31xf32>
    %579 = arith.mulf %578, %13 : vector<16x31xf32>
    %580 = arith.addf %576, %579 : vector<16x31xf32>
    %c7_308 = arith.constant 7 : index
    %c2_309 = arith.constant 2 : index
    %581 = memref.load %arg6[%c7_308, %c2_309] : memref<8x6xf32, #tpu.memory_space<smem>>
    %582 = vector.broadcast %581 : f32 to vector<16x31xf32>
    %583 = arith.mulf %582, %18 : vector<16x31xf32>
    %584 = arith.addf %580, %583 : vector<16x31xf32>
    %c7_310 = arith.constant 7 : index
    %c3_311 = arith.constant 3 : index
    %585 = memref.load %arg6[%c7_310, %c3_311] : memref<8x6xf32, #tpu.memory_space<smem>>
    %586 = vector.broadcast %585 : f32 to vector<16x31xf32>
    %587 = arith.mulf %586, %8 : vector<16x31xf32>
    %c7_312 = arith.constant 7 : index
    %c4_313 = arith.constant 4 : index
    %588 = memref.load %arg6[%c7_312, %c4_313] : memref<8x6xf32, #tpu.memory_space<smem>>
    %589 = vector.broadcast %588 : f32 to vector<16x31xf32>
    %590 = arith.mulf %589, %13 : vector<16x31xf32>
    %591 = arith.addf %587, %590 : vector<16x31xf32>
    %c7_314 = arith.constant 7 : index
    %c5_315 = arith.constant 5 : index
    %592 = memref.load %arg6[%c7_314, %c5_315] : memref<8x6xf32, #tpu.memory_space<smem>>
    %593 = vector.broadcast %592 : f32 to vector<16x31xf32>
    %594 = arith.mulf %593, %18 : vector<16x31xf32>
    %595 = arith.addf %591, %594 : vector<16x31xf32>
    %cst_316 = arith.constant dense<0.000000e+00> : vector<16x31xf32>
    %596 = tpu.matmul %566, %584, %cst_316 {dimension_numbers = #tpu.dot_dimension_numbers<[1], [0], [0], [1], [0, 0, 1, 1], [], []>} : vector<16x16xf32>, vector<16x31xf32>, vector<16x31xf32> -> vector<16x31xf32>
    %cst_317 = arith.constant dense<0.000000e+00> : vector<16x31xf32>
    %597 = tpu.matmul %573, %595, %cst_317 {dimension_numbers = #tpu.dot_dimension_numbers<[1], [0], [0], [1], [0, 0, 1, 1], [], []>} : vector<16x16xf32>, vector<16x31xf32>, vector<16x31xf32> -> vector<16x31xf32>
    %598 = arith.addf %596, %597 : vector<16x31xf32>
    %c7_318 = arith.constant 7 : index
    %599 = memref.load %arg7[%c7_318] : memref<8xf32, #tpu.memory_space<smem>>
    %600 = vector.broadcast %599 : f32 to vector<16x31xf32>
    %601 = arith.addf %598, %600 : vector<16x31xf32>
    %c0_319 = arith.constant 0 : index
    %c7_320 = arith.constant 7 : index
    %c0_321 = arith.constant 0 : index
    %c0_322 = arith.constant 0 : index
    %602 = vector.load %arg8[%c0_319, %c7_320, %c0_321, %c0_322] : memref<1x8x16x31xf32, #tpu.memory_space<vmem>>, vector<1x1x16x31xf32>
    %603 = vector.shape_cast %602 : vector<1x1x16x31xf32> to vector<16x31xf32>
    %604 = vector.shape_cast %601 : vector<16x31xf32> to vector<1x1x16x31xf32>
    tpu.vector_store %arg8[%c0_319, %c7_320, %c0_321, %c0_322], %604 {strides = array<i32>} : memref<1x8x16x31xf32, #tpu.memory_space<vmem>>, vector<1x1x16x31xf32>,
    return
  }
  func.func @transform_0(%arg0: i32, %arg1: i32) -> (i32, i32, i32, i32) {
    %c0_i32 = arith.constant 0 : i32
    %c0_i32_0 = arith.constant 0 : i32
    %c0_i32_1 = arith.constant 0 : i32
    return %arg0, %c0_i32, %arg1, %c0_i32_0 : i32, i32, i32, i32
  }
  func.func @transform_1(%arg0: i32, %arg1: i32) -> (i32, i32, i32, i32) {
    %c2_i32 = arith.constant 2 : i32
    %0 = arith.muli %arg1, %c2_i32 : i32
    %c1_i32 = arith.constant 1 : i32
    %1 = arith.subi %0, %c1_i32 : i32
    %c0_i32 = arith.constant 0 : i32
    %2 = arith.maxsi %1, %c0_i32 : i32
    %c0_i32_0 = arith.constant 0 : i32
    %c0_i32_1 = arith.constant 0 : i32
    %c0_i32_2 = arith.constant 0 : i32
    return %arg0, %c0_i32_0, %2, %c0_i32_1 : i32, i32, i32, i32
  }
  func.func @transform_2(%arg0: i32, %arg1: i32) -> (i32, i32) {
    %c0_i32 = arith.constant 0 : i32
    %c0_i32_0 = arith.constant 0 : i32
    %c0_i32_1 = arith.constant 0 : i32
    return %c0_i32, %c0_i32_0 : i32, i32
  }
  func.func @transform_3(%arg0: i32, %arg1: i32) -> i32 {
    %c0_i32 = arith.constant 0 : i32
    %c0_i32_0 = arith.constant 0 : i32
    return %c0_i32 : i32
  }
  func.func @transform_4(%arg0: i32, %arg1: i32) -> (i32, i32) {
    %c0_i32 = arith.constant 0 : i32
    %c0_i32_0 = arith.constant 0 : i32
    %c0_i32_1 = arith.constant 0 : i32
    return %c0_i32, %c0_i32_0 : i32, i32
  }
  func.func @transform_5(%arg0: i32, %arg1: i32) -> i32 {
    %c0_i32 = arith.constant 0 : i32
    %c0_i32_0 = arith.constant 0 : i32
    return %c0_i32 : i32
  }
  func.func @transform_6(%arg0: i32, %arg1: i32) -> (i32, i32, i32, i32) {
    %c0_i32 = arith.constant 0 : i32
    %c0_i32_0 = arith.constant 0 : i32
    %c0_i32_1 = arith.constant 0 : i32
    return %arg0, %c0_i32, %arg1, %c0_i32_0 : i32, i32, i32, i32
  }
}

</mosaic_0001>

<bundles_post_ra>
// kernel: depth_sep_deconv2d.1
= control target key start
LH: loop header
LB: loop body
LE: loop exit
PB: predicated region body
PF: predicated region fallthrough
CT: control target
= control target key end

     0   :  { %s3351_s0 = inlined_call_operand.hbm [shape: f32[2,4,16,16], index: 0, kind: input, shape index: {}, may-alias: {0,1}]   ;;  %s3352_s1 = inlined_call_operand.hbm [shape: f32[2,4,16,16], index: 1, kind: input, shape index: {}, may-alias: {0,1}]   ;;  %s3353_s2 = inlined_call_operand.vmem [shape: f32[8,4], index: 2, kind: input, shape index: {}]   ;;  %s3354_s3 = inlined_call_operand.vmem [shape: f32[8], index: 3, kind: input, shape index: {}]   ;;  %s3355_s4 = inlined_call_operand.vmem [shape: f32[8,6], index: 4, kind: input, shape index: {}]   ;;  %s3356_s5 = inlined_call_operand.vmem [shape: f32[8], index: 5, kind: input, shape index: {}]   ;;  %s3357_s6 = inlined_call_operand.hbm [shape: f32[2,8,16,31], index: 6, kind: output, shape index: {}]  }
   0x1   :  { %3359 = sst [smem:[#allocation22_spill]] %s3351_s0 }
   0x2   :  { %3360 = sst [smem:[#allocation23_spill]] %s3353_s2 }
   0x3   :  { %3361 = sst [smem:[#allocation24_spill]] %s3354_s3 }
   0x4   :  { %3362 = sst [smem:[#allocation25_spill]] %s3355_s4 }
   0x5   :  { %3363 = sst [smem:[#allocation26_spill]] %s3356_s5 }
   0x6   :  { %11 = vsyncpa [#allocation3], 0 }
   0x7   :  { %13 = vsyncpa [#allocation3 + $0x1], 0 }
   0x8   :  { %14 = vsyncpa [#allocation7], 0 }
   0x9   :  { %16 = vsyncpa [#allocation7 + $0x1], 0 }
   0xa   :  { %17 = vsyncpa [#allocation5], 0 }
   0xb   :  { %18 = vsyncpa [#allocation10], 0 }
   0xc   :  { %19 = vsyncpa [#allocation13], 0 }
   0xd   :  { %20 = vsyncpa [#allocation4], 0 }
   0xe   :  { %22 = vsyncpa [#allocation4 + $0x1], 0  ;;  %s2287_s21 = smov 0   ;;  %s2289_s22 = smov 0  }
   0xf   :  { %s2291_s23 = smov 0   ;;  %s2293_s24 = smov 0  }
  0x10   :  { %s2295_s25 = smov 0   ;;  %s2297_s26 = smov 0  }
  0x11 LB: > { %s1717_s27 = sadd.s32 4294967295, %s2240_s26   ;;  %s1718_s28 = sadd.s32 4294967294, %s2240_s26   ;;  %s2240_s26 = sphi %s2297_s26, %s28_s26   ;;  %s2236_s25 = sphi %s2295_s25, %s3383_s25   ;;  %s2232_s24 = sphi %s2293_s24, %s3382_s24   ;;  %s2228_s23 = sphi %s2291_s23, %s3381_s23   ;;  %s2224_s22 = sphi %s2289_s22, %s3380_s22   ;;  %s2220_s21 = sphi %s2287_s21, %s3379_s21  }
  0x12   : > { %p62_p0 = scmp.ne.s32.totalorder %s2224_s22, %s2220_s21  ;;  %p2321_p1 = scmp.eq.s32.totalorder %s1717_s27, 0 }
  0x13   : > { %p2325_p2 = scmp.eq.s32.totalorder %s1717_s27, 1  ;;  %p214_p3 = scmp.eq.s32.totalorder %s1718_s28, 1 }
  0x14   : > { %p2331_p4 = por %p2321_p1, %p62_p0  ;;  %p1719_p5 = scmp.ge.s32.totalorder %s2240_s26, 1 }
  0x15   : > { %p2336_p6 = por %p214_p3, %p62_p0  ;;  %p221_p7 = scmp.lt.s32.totalorder %s2240_s26, 3 }
  0x16   : > { %s3368_s3 = sld [smem:[#allocation24_spill]]  ;;  %p1724_p9 = scmp.ge.s32.totalorder %s2240_s26, 2 }
  0x17   : > { %p2344_p8 = pnand %p1719_p5, %p221_p7  ;;  %s3370_s2 = sld [smem:[#allocation23_spill]] }
  0x18   : > { %s3371_s4 = sld [smem:[#allocation25_spill]]  ;;  %s2242_s19 = smov [#allocation9]  }
  0x19   : > { %p1922_p10 = pneg %p2344_p8  ;;  %s2243_s20 = smov [#allocation8]  }
  0x1a   : > { %s3372_s5 = sld [smem:[#allocation26_spill]]  ;;  %s2244_s10 = smov [#allocation11]  }
  0x1b   : > { %p1923_p11 = pnand %p1922_p10, %p2321_p1  ;;  %s2245_s13 = smov [#allocation12]  }
  0x1c   : > { %s243_s11 = sshll.u32 %s3368_s3, 4  ;;  %s40_s14 = sadd.s32 1, %s2236_s25  ;;  %s244_s11 = int_to_ptr.vmem [resolvable:$true] %s243_s11 }
  0x1d   : > { %s233_s15 = sshll.u32 %s3370_s2, 4  ;;  %s49_s16 = sadd.s32 1, %s2228_s23  ;;  %s234_s15 = int_to_ptr.vmem [resolvable:$true] %s233_s15 }
  0x1e   : > { %s253_s18 = sshll.u32 %s3371_s4, 4  ;;  %p42_p12 = scmp.ge.s32.totalorder %s40_s14, 2  ;;  %s254_s18 = int_to_ptr.vmem [resolvable:$true] %s253_s18 }
  0x1f   : > { %1928 = dma.vmem_to_smem (!%p1923_p11), %s244_s11, 16, %s2242_s19, [#allocation10]  }
  0x20   : > { %1925 = dma.vmem_to_smem (!%p1923_p11), %s234_s15, 128, %s2243_s20, [#allocation5]  }
  0x21   : > { %s263_s9 = sshll.u32 %s3372_s5, 4  ;;  %p56_p13 = scmp.ne.s32.totalorder %s2228_s23, %s2224_s22  ;;  %s264_s9 = int_to_ptr.vmem [resolvable:$true] %s263_s9 }
  0x22   : > { %1931 = dma.vmem_to_smem (!%p1923_p11), %s254_s18, 128, %s2244_s10, [#allocation10]  }
  0x23   : > { %1934 = dma.vmem_to_smem (!%p1923_p11), %s264_s9, 16, %s2245_s13, [#allocation13]  }
  0x24   : > { %p57_p0 = scmp.eq.s32.totalorder %s2240_s26, 0  ;;  %p1950_p3 = scmp.lt.s32.totalorder %s2240_s26, 2 }
  0x25   : > { %s3385_s14 = smov (%p42_p12, %s40_s14), 0  ;;  %p2376_p7 = por %p2325_p2, %p56_p13 }
  0x26   : > { %3373 = sst [smem:[#allocation21_spill]] %s3385_s14  ;;  %p2370_p5 = por %p57_p0, %p56_p13 }
  0x27   : > { %s44_s17 = ssub.s32 %s2236_s25, %s3385_s14  ;;  %s2383_s18 = sand.u32 1, %s2228_s23  }
  0x28   : > { %p47_p10 = scmp.eq.s32.totalorder %s44_s17, 0  ;;  %s1725_s19 = sshll.u32 %s2383_s18, 6 }
  0x29   : > { %s1897_s20 = sshll.u32 %s2236_s25, 6  ;;  %s3376_s0 = sld [smem:[#allocation22_spill]] }
  0x2a   : > { %s2388_s27 = scalar_select %p47_p10, %s2228_s23, %s49_s16  }
  0x2b   : > { %s278_s13 = scalar_lea.vmem [#allocation2], %s1725_s19  ;;  %p2397_p2 = pnand %p1950_p3, %p2370_p5 }
  0x2c   : > { %s288_s2 = sshll.u32 %s278_s13, 4  ;;  %s312_s16 = scalar_lea.hbm %s3352_s1, %s1897_s20  ;;  %s289_s2 = int_to_ptr.vmem [resolvable:$true] %s288_s2 }
  0x2d   : > { %s313_s28 = sshll.u32 %s312_s16, 4  ;;  %s275_s9 = scalar_lea.sflag [#allocation3], %s2383_s18  ;;  %s314_s28 = int_to_ptr.hbm [resolvable:$true] %s313_s28 }
  0x2e   : > { %s2247_s19 = smov 8   ;;  %s1728_s13 = sshll.u32 %s2383_s18, 5 }
  0x2f   : > { %s285_s30 = scalar_lea.hbm %s3376_s0, %s1897_s20  ;;  %s302_s11 = scalar_lea.vmem [#allocation6], %s1728_s13 }
  0x30   : > { %s286_s10 = sshll.u32 %s285_s30, 4  ;;  %s2246_s30 = smov 128   ;;  %s287_s10 = int_to_ptr.hbm [resolvable:$true] %s286_s10 }
  0x31   : > { %1938 = dma.hbm_to_vmem [thread:$0]  (!%p2397_p2), %s287_s10, 1024, %s289_s2, %s275_s9, %s2246_s30, %s2246_s30, %s2247_s19  }
  0x32   : > { %s315_s0 = sshll.u32 %s302_s11, 4  ;;  %s299_s5 = scalar_lea.sflag [#allocation7], %s2383_s18  ;;  %s316_s0 = int_to_ptr.vmem [resolvable:$true] %s315_s0 }
  0x33   : > { %s2248_s14 = smov 256   ;;  %327 = sbr.rel (%p2344_p8) target bundleno = 343 (0x157), region = 44 }
  0x34   : > { %1941 = dma.hbm_to_vmem [thread:$0]  (!%p2397_p2), %s314_s28, 512, %s316_s0, %s299_s5, %s2248_s14, %s2246_s30, %s2247_s19  }
  0x35   : > { %s2414_s4 = sand.u32 (!%p2344_p8), 1, %s2224_s22  }
  0x36   : > { %s1732_s20 = sshll.u32 (!%p2344_p8), %s2414_s4, 6  ;;  %s330_s2 = scalar_lea.sflag (!%p2344_p8), [#allocation3], %s2414_s4 }
  0x37   : > { %s2418_s10 = scalar_lea.vmem (!%p2344_p8), [#allocation2], %s1732_s20 }
  0x38   : > { %2195 = dma.done.wait (%p2331_p4), %s330_s2, 1024  }
  0x39   : > { %2197 = vsyncadd (%p2331_p4), %s330_s2, 4294966272  ;;  %s1733_s0 = sshll.u32 %s2414_s4, 5  ;;  %s340_s3 = scalar_lea.sflag [#allocation7], %s2414_s4 }
  0x3a   : > { %s2426_s5 = scalar_lea.vmem [#allocation6], %s1733_s0 }
  0x3b   : > { %2199 = dma.done.wait (%p2331_p4), %s340_s3, 512  }
  0x3c   : > { %2201 = vsyncadd (%p2331_p4), %s340_s3, 4294966784 }
  0x3d   : > { %2203 = dma.done.wait (%p2321_p1), [#allocation5], 128  }
  0x3e   : > { %2205 = vsyncadd (%p2321_p1), [#allocation5], 4294967168 }
  0x3f   : > { %2207 = dma.done.wait (%p2321_p1), [#allocation10], 144  }
  0x40   : > { %2209 = vsyncadd (%p2321_p1), [#allocation10], 4294967152 }
  0x41   : > { %2211 = dma.done.wait (%p2321_p1), [#allocation13], 16  }
  0x42   : > { %2213 = vsyncadd (%p2321_p1), [#allocation13], 4294967280 }
  0x43   : > { %369 = sfence }
  0x44   : > { %v405_v0 = vlaneseq  ;;  %s2444_s7 = sld [smem:[#allocation11 + $0x83]]  ;;  %v2249_v10 = vmov 0.0   ;;  %v2499_v32 = vld [vmem:[%s2418_s10] sm:$0xff]  ;;  %v2502_v33 = vld [vmem:[%s2418_s10 + $0x10] sm:$0xff]  ;;  %v2512_v39 = vld [vmem:[%s2426_s5 + $0xf] sm:$0x1] }
  0x45   : > { %s2446_s12 = sld [smem:[#allocation11 + $0x84]]  ;;  %v2509_v38 = vld [vmem:[%s2426_s5 + $0x7] sm:$0x1]  ;;  %v2530_v48 = vld [vmem:[%s2418_s10 + $0x30] sm:$0xff]  ;;  %vm531_vm6 = vcmask 130048   ;;  %vm493_vm7 = vcmask 1040384  }
  0x46   : > { %v406_v1 = vshrl.u32 %v405_v0, 7  ;;  %v411_v2 = vand.u32 127, %v405_v0  ;;  %s2448_s14 = sld [smem:[#allocation11 + $0x85]]  ;;  %v2527_v47 = vld [vmem:[%s2418_s10 + $0x20] sm:$0xff]  ;;  %v2537_v51 = vld [vmem:[%s2426_s5 + $0x17] sm:$0x1] }
  0x47   : > { %s2450_s18 = sld [smem:[#allocation11 + $0x80]]  ;;  %v2540_v52 = vld [vmem:[%s2426_s5 + $0x1f] sm:$0x1]  ;;  %vm591_vm8 = vcmask 252928  }
  0x48   : > { %v407_v3 = vadd.s32 8, %v406_v1  ;;  %v412_v4 = vadd.s32 1, %v411_v2  ;;  %s2452_s17 = sld [smem:[#allocation11 + $0x81]]  ;;  %v408_v5 = vmul.u32 2, %v406_v1 }
  0x49   : > { %s2454_s29 = sld [smem:[#allocation11 + $0x82]] }
  0x4a   : > { %v409_v6 = vmul.u32 2, %v407_v3  ;;  %vm413_vm0 = vcmp.eq.s32.totalorder %v412_v4, %v408_v5  ;;  %v419_v7 = vadd.s32 1, %v408_v5  ;;  %s2456_s16 = sld [smem:[#allocation8 + $0x80]]  ;;  %v653_v8 = vstv %s2444_s7 }
  0x4b   : > { %v657_v9 = vstv %s2446_s12  ;;  %v2460_v11 = vsel %vm413_vm0, 1.0, %v2249_v10  ;;  %v427_v12 = vadd.s32 2, %v408_v5  ;;  %s2462_s28 = sld [smem:[#allocation8 + $0x81]] }
  0x4c   : > { %vm414_vm1 = vcmp.eq.s32.totalorder %v412_v4, %v409_v6  ;;  %v420_v13 = vadd.s32 1, %v409_v6  ;;  %v428_v14 = vadd.s32 2, %v409_v6  ;;  %v663_v15 = vstv %s2448_s14  ;;  %s2465_s9 = sld [smem:[#allocation8 + $0x82]] }
  0x4d   : > { %v2467_v16 = vsel %vm414_vm1, 1.0, %v2249_v10  ;;  %v637_v17 = vstv %s2450_s18  ;;  %vm421_vm2 = vcmp.eq.s32.totalorder %v412_v4, %v419_v7  ;;  %vm429_vm3 = vcmp.eq.s32.totalorder %v412_v4, %v427_v12  ;;  %s2470_s30 = sld [smem:[#allocation8 + $0x83]] }
  0x4e   : > { %vm422_vm4 = vcmp.eq.s32.totalorder %v412_v4, %v420_v13  ;;  %vm430_vm5 = vcmp.eq.s32.totalorder %v412_v4, %v428_v14  ;;  %v655_v18 = vmul.f32 %v2467_v16, %v653_v8  ;;  %v639_v19 = vmul.f32 %v2467_v16, %v637_v17  ;;  %s2474_s19 = sld [smem:[#allocation9 + $0x1]] }
  0x4f   : > { %v2476_v20 = vsel %vm422_vm4, 1.0, %v2249_v10  ;;  %v2478_v21 = vsel %vm430_vm5, 1.0, %v2249_v10  ;;  %v641_v22 = vstv %s2452_s17  ;;  %v647_v23 = vstv %s2454_s29  ;;  %s2482_s13 = sld [smem:[#allocation11 + $0x183]] }
  0x50   : > { %v659_v24 = vmul.f32 %v2476_v20, %v657_v9  ;;  %v665_v25 = vmul.f32 %v2478_v21, %v663_v15  ;;  %v643_v26 = vmul.f32 %v2476_v20, %v641_v22  ;;  %v649_v27 = vmul.f32 %v2478_v21, %v647_v23  ;;  %s2488_s11 = sld [smem:[#allocation11 + $0x184]] }
  0x51   : > { %v2491_v28 = vsel %vm421_vm2, 1.0, %v2249_v10  ;;  %v2494_v29 = vsel %vm429_vm3, 1.0, %v2249_v10  ;;  %v654_v30 = vmul.f32 %v2460_v11, %v653_v8  ;;  %v638_v31 = vmul.f32 %v2460_v11, %v637_v17  ;;  %s2504_s20 = sld [smem:[#allocation11 + $0x185]] }
  0x52   : > { %v661_v34 = vadd.f32 %v659_v24, %v655_v18  ;;  %v645_v35 = vadd.f32 %v643_v26, %v639_v19  ;;  %v658_v36 = vmul.f32 %v2491_v28, %v657_v9  ;;  %v664_v37 = vmul.f32 %v2494_v29, %v663_v15  ;;  %s2514_s2 = sld [smem:[#allocation11 + $0x180]] }
  0x53   : > { %v642_v40 = vmul.f32 %v2491_v28, %v641_v22  ;;  %v648_v41 = vmul.f32 %v2494_v29, %v647_v23  ;;  %v2519_v42 = vstv %s2456_s16  ;;  %v2522_v43 = vstv %s2462_s28  ;;  %s2524_s0 = sld [smem:[#allocation11 + $0x181]] }
  0x54   : > { %v667_v44 = vadd.f32 %v665_v25, %v661_v34  ;;  %v651_v45 = vadd.f32 %v649_v27, %v645_v35  ;;  %v660_v46 = vadd.f32 %v658_v36, %v654_v30  ;;  %v596_v49 = vmul.f32 %v2519_v42, %v2499_v32  ;;  %s2534_s3 = sld [smem:[#allocation11 + $0x182]] }
  0x55   : > { %v644_v50 = vadd.f32 %v642_v40, %v638_v31  ;;  %v598_v53 = vmul.f32 %v2519_v42, %v2509_v38  ;;  %v601_v54 = vmul.f32 %v2502_v33, %v2522_v43  ;;  %v605_v55 = vmul.f32 %v2512_v39, %v2522_v43  ;;  %s2548_s7 = sld [smem:[#allocation11 + $0x3]] }
  0x56   : > { %687 = vmatpush.msra.mxu2 %v667_v44  ;;  %714 = vmatpush.msra.mxu3 %v651_v45  ;;  %v666_v56 = vadd.f32 %v664_v37, %v660_v46  ;;  %v2551_v57 = vstv %s2465_s9  ;;  %v2554_v58 = vstv %s2470_s30  ;;  %v2557_v59 = vstv %s2474_s19  ;;  %s2559_s12 = sld [smem:[#allocation11 + $0x4]] }
  0x57   : > { %v650_v60 = vadd.f32 %v648_v41, %v644_v50  ;;  %v603_v61 = vadd.f32 %v601_v54, %v596_v49  ;;  %v606_v62 = vadd.f32 %v605_v55, %v598_v53  ;;  %v609_v63 = vmul.f32 %v2527_v47, %v2551_v57  ;;  %s2563_s14 = sld [smem:[#allocation11 + $0x5]] }
  0x58   : > { %688 = vmatpush.msra.mxu2 %v666_v56  ;;  %v613_v0 = vmul.f32 %v2537_v51, %v2551_v57  ;;  %v617_v1 = vmul.f32 %v2530_v48, %v2554_v58  ;;  %v621_v2 = vmul.f32 %v2540_v52, %v2554_v58  ;;  %v925_v3 = vstv %s2482_s13  ;;  %s2572_s18 = sld [smem:[#allocation11]] }
  0x59   : > { %715 = vmatpush.msra.mxu3 %v650_v60  ;;  %v611_v4 = vadd.f32 %v609_v63, %v603_v61  ;;  %v927_v5 = vmul.f32 %v2467_v16, %v925_v3  ;;  %v929_v6 = vstv %s2488_s11  ;;  %v935_v7 = vstv %s2504_s20  ;;  %s2579_s17 = sld [smem:[#allocation11 + $0x1]] }
  0x5a   : > { %v614_v8 = vadd.f32 %v613_v0, %v606_v62  ;;  %v931_v9 = vmul.f32 %v2476_v20, %v929_v6  ;;  %v937_v10 = vmul.f32 %v2478_v21, %v935_v7  ;;  %v909_v12 = vstv %s2514_s2  ;;  %s2588_s29 = sld [smem:[#allocation11 + $0x2]] }
  0x5b   : > { %v619_v13 = vadd.f32 %v617_v1, %v611_v4  ;;  %v911_v14 = vmul.f32 %v2467_v16, %v909_v12  ;;  %v913_v15 = vstv %s2524_s0  ;;  %v919_v17 = vstv %s2534_s3  ;;  %s2595_s16 = sld [smem:[#allocation8]] }
  0x5c   : > { %v622_v18 = vadd.f32 %v621_v2, %v614_v8  ;;  %v933_v19 = vadd.f32 %v931_v9, %v927_v5  ;;  %v915_v22 = vmul.f32 %v2476_v20, %v913_v15  ;;  %v921_v23 = vmul.f32 %v2478_v21, %v919_v17  ;;  %s2603_s28 = sld [smem:[#allocation8 + $0x1]] }
  0x5d   : > { %v2606_v24 = vadd.f32 %v2557_v59, %v619_v13  ;;  %v516_v25 = vstv %s2548_s7  ;;  %v520_v26 = vstv %s2559_s12  ;;  %v526_v27 = vstv %s2563_s14  ;;  %s2611_s9 = sld [smem:[#allocation8 + $0x2]] }
  0x5e   : > { %v627_v30 = vadd.f32 %v2557_v59, %v622_v18  ;;  %v939_v31 = vadd.f32 %v937_v10, %v933_v19  ;;  %v917_v34 = vadd.f32 %v915_v22, %v911_v14  ;;  %v518_v35 = vmul.f32 %v2467_v16, %v516_v25  ;;  %s2615_s30 = sld [smem:[#allocation8 + $0x3]] }
  0x5f   : > { %v631_v36 = vrot.slane %v2606_v24, 7  ;;  %1779 = vmatmul.msk.f32.vlgmr.msra.gmra.mxu3 %vm531_vm6, %v2606_v24  ;;  %v522_v37 = vmul.f32 %v2476_v20, %v520_v26  ;;  %v528_v40 = vmul.f32 %v2478_v21, %v526_v27  ;;  %v500_v41 = vstv %s2572_s18  ;;  %s2623_s19 = sld [smem:[#allocation9]] }
  0x60   : > { %v628_v44 = vmul.f32 0.0, %v627_v30  ;;  %959 = vmatpush.msrb.mxu2 %v939_v31  ;;  %v923_v45 = vadd.f32 %v921_v23, %v917_v34  ;;  %v502_v46 = vmul.f32 %v2467_v16, %v500_v41  ;;  %v504_v49 = vstv %s2579_s17  ;;  %s2627_s7 = sld [smem:[#allocation11 + $0x103]] }
  0x61   : > { %v524_v50 = vadd.f32 %v522_v37, %v518_v35  ;;  %v506_v53 = vmul.f32 %v2476_v20, %v504_v49  ;;  %v510_v54 = vstv %s2588_s29  ;;  %v517_v55 = vmul.f32 %v2460_v11, %v516_v25  ;;  %s2632_s12 = sld [smem:[#allocation11 + $0x104]] }
  0x62   : > { %v635_v56 = vsel %vm493_vm7, %v628_v44, %v631_v36  ;;  %986 = vmatpush.msrb.mxu3 %v923_v45  ;;  %v512_v60 = vmul.f32 %v2478_v21, %v510_v54  ;;  %v521_v61 = vmul.f32 %v2491_v28, %v520_v26  ;;  %v527_v62 = vmul.f32 %v2494_v29, %v526_v27  ;;  %s2640_s14 = sld [smem:[#allocation11 + $0x105]] }
  0x63   : > { %1777 = vmatmul.msk.f32.vlgmr.msra.gmra.mxu2 %vm531_vm6, %v635_v56  ;;  %v530_v63 = vadd.f32 %v528_v40, %v524_v50  ;;  %v508_v0 = vadd.f32 %v506_v53, %v502_v46  ;;  %v501_v1 = vmul.f32 %v2460_v11, %v500_v41  ;;  %v505_v2 = vmul.f32 %v2491_v28, %v504_v49  ;;  %s2645_s18 = sld [smem:[#allocation11 + $0x100]]  ;;  %v2694_v56 = vld [vmem:[%s2418_s10 + $0x18] sm:$0xff] }
  0x64   : > { %v523_v4 = vadd.f32 %v521_v61, %v517_v55  ;;  %v511_v5 = vmul.f32 %v2494_v29, %v510_v54  ;;  %v2649_v8 = vstv %s2595_s16  ;;  %v2652_v9 = vstv %s2603_s28  ;;  %s2654_s17 = sld [smem:[#allocation11 + $0x101]]  ;;  %v2691_v55 = vld [vmem:[%s2418_s10 + $0x8] sm:$0xff] }
  0x65   : > { %551 = vmatpush.msra.mxu0 %v530_v63  ;;  %v514_v10 = vadd.f32 %v512_v60, %v508_v0  ;;  %v507_v13 = vadd.f32 %v505_v2, %v501_v1  ;;  %v457_v14 = vmul.f32 %v2649_v8, %v2499_v32  ;;  %v459_v18 = vmul.f32 %v2649_v8, %v2509_v38  ;;  %s2660_s29 = sld [smem:[#allocation11 + $0x102]]  ;;  %v2703_v0 = vld [vmem:[%s2418_s10 + $0x28] sm:$0xff] }
  0x66   : > { %v529_v19 = vadd.f32 %v527_v62, %v523_v4  ;;  %v462_v22 = vmul.f32 %v2502_v33, %v2652_v9  ;;  %v466_v23 = vmul.f32 %v2512_v39, %v2652_v9  ;;  %v2667_v25 = vstv %s2611_s9  ;;  %s2705_s16 = sld [smem:[#allocation8 + $0x180]] }
  0x67   : > { %578 = vmatpush.msra.mxu1 %v514_v10  ;;  %v513_v26 = vadd.f32 %v511_v5, %v507_v13  ;;  %v470_v27 = vmul.f32 %v2527_v47, %v2667_v25  ;;  %v474_v30 = vmul.f32 %v2537_v51, %v2667_v25  ;;  %v2674_v31 = vstv %s2615_s30  ;;  %v2709_v10 = vld [vmem:[%s2418_s10 + $0x38] sm:$0xff]  ;;  %s2717_s28 = sld [smem:[#allocation8 + $0x181]] }
  0x68   : > { %552 = vmatpush.msra.mxu0 %v529_v19  ;;  %v464_v34 = vadd.f32 %v462_v22, %v457_v14  ;;  %v467_v35 = vadd.f32 %v466_v23, %v459_v18  ;;  %v478_v37 = vmul.f32 %v2530_v48, %v2674_v31  ;;  %v482_v40 = vmul.f32 %v2540_v52, %v2674_v31  ;;  %s2725_s9 = sld [smem:[#allocation8 + $0x182]] }
  0x69   : > { %579 = vmatpush.msra.mxu1 %v513_v26  ;;  %v2681_v41 = vstv %s2623_s19  ;;  %v789_v44 = vstv %s2627_s7  ;;  %v793_v45 = vstv %s2632_s12  ;;  %v799_v46 = vstv %s2640_s14  ;;  %s2732_s30 = sld [smem:[#allocation8 + $0x183]] }
  0x6a   : > { %v472_v49 = vadd.f32 %v470_v27, %v464_v34  ;;  %v475_v50 = vadd.f32 %v474_v30, %v467_v35  ;;  %v791_v53 = vmul.f32 %v2467_v16, %v789_v44  ;;  %v795_v54 = vmul.f32 %v2476_v20, %v793_v45  ;;  %s2743_s19 = sld [smem:[#allocation9 + $0x3]] }
  0x6b   : > { %v801_v60 = vmul.f32 %v2478_v21, %v799_v46  ;;  %v773_v61 = vstv %s2645_s18  ;;  %v777_v62 = vstv %s2654_s17  ;;  %v783_v63 = vstv %s2660_s29  ;;  %s2751_s13 = sld [smem:[#allocation11 + $0x283]] }
  0x6c   : > { %v480_v1 = vadd.f32 %v478_v37, %v472_v49  ;;  %v483_v2 = vadd.f32 %v482_v40, %v475_v50  ;;  %v797_v4 = vadd.f32 %v795_v54, %v791_v53  ;;  %v775_v5 = vmul.f32 %v2467_v16, %v773_v61  ;;  %s2761_s11 = sld [smem:[#allocation11 + $0x284]] }
  0x6d   : > { %v779_v13 = vmul.f32 %v2476_v20, %v777_v62  ;;  %v785_v14 = vmul.f32 %v2478_v21, %v783_v63  ;;  %v597_v18 = vmul.f32 %v2519_v42, %v2691_v55  ;;  %v602_v19 = vmul.f32 %v2694_v56, %v2522_v43  ;;  %s2769_s20 = sld [smem:[#allocation11 + $0x285]] }
  0x6e   : > { %v2720_v22 = vadd.f32 %v2681_v41, %v480_v1  ;;  %v488_v23 = vadd.f32 %v2681_v41, %v483_v2  ;;  %v803_v26 = vadd.f32 %v801_v60, %v797_v4  ;;  %v610_v27 = vmul.f32 %v2703_v0, %v2551_v57  ;;  %s2776_s2 = sld [smem:[#allocation11 + $0x280]] }
  0x6f   : > { %v781_v42 = vadd.f32 %v779_v13, %v775_v5  ;;  %v604_v30 = vadd.f32 %v602_v19, %v597_v18  ;;  %v618_v43 = vmul.f32 %v2709_v10, %v2554_v58  ;;  %v926_v34 = vmul.f32 %v2460_v11, %v925_v3  ;;  %s2782_s0 = sld [smem:[#allocation11 + $0x281]] }
  0x70   : > { %v490_v35 = vmul.f32 0.0, %v488_v23  ;;  %v494_v37 = vrot.slane %v2720_v22, 7  ;;  %1764 = vmatmul.msk.f32.vlgmr.msra.gmra.mxu1 %vm531_vm6, %v2720_v22  ;;  %823 = vmatpush.msrb.mxu0 %v803_v26  ;;  %v930_v57 = vmul.f32 %v2491_v28, %v929_v6  ;;  %v936_v40 = vmul.f32 %v2494_v29, %v935_v7  ;;  %s2790_s3 = sld [smem:[#allocation11 + $0x282]] }
  0x71   : > { %v787_v58 = vadd.f32 %v785_v14, %v781_v42  ;;  %v612_v3 = vadd.f32 %v610_v27, %v604_v30  ;;  %v910_v49 = vmul.f32 %v2460_v11, %v909_v12  ;;  %v914_v50 = vmul.f32 %v2491_v28, %v913_v15  ;;  %s2795_s7 = sld [smem:[#allocation8 + $0x100]] }
  0x72   : > { %v498_v6 = vsel %vm493_vm7, %v490_v35, %v494_v37  ;;  %v932_v53 = vadd.f32 %v930_v57, %v926_v34  ;;  %v920_v7 = vmul.f32 %v2494_v29, %v919_v17  ;;  %v458_v54 = vmul.f32 %v2649_v8, %v2691_v55  ;;  %s2805_s12 = sld [smem:[#allocation8 + $0x101]] }
  0x73   : > { %1762 = vmatmul.msk.f32.vlgmr.msra.gmra.mxu0 %vm531_vm6, %v498_v6  ;;  %850 = vmatpush.msrb.mxu1 %v787_v58  ;;  %v620_v12 = vadd.f32 %v618_v43, %v612_v3  ;;  %v916_v15 = vadd.f32 %v914_v50, %v910_v49  ;;  %v463_v60 = vmul.f32 %v2694_v56, %v2652_v9  ;;  %v2767_v1 = vstv %s2705_s16  ;;  %s2812_s14 = sld [smem:[#allocation8 + $0x102]] }
  0x74   : > { %v938_v17 = vadd.f32 %v936_v40, %v932_v53  ;;  %v471_v8 = vmul.f32 %v2703_v0, %v2667_v25  ;;  %v479_v2 = vmul.f32 %v2709_v10, %v2674_v31  ;;  %v790_v4 = vmul.f32 %v2460_v11, %v789_v44  ;;  %s2821_s18 = sld [smem:[#allocation8 + $0x103]] }
  0x75   : > { %v626_v5 = vadd.f32 %v2557_v59, %v620_v12  ;;  %v922_v13 = vadd.f32 %v920_v7, %v916_v15  ;;  %v465_v14 = vadd.f32 %v463_v60, %v458_v54  ;;  %v794_v9 = vmul.f32 %v2491_v28, %v793_v45  ;;  %s2830_s17 = sld [smem:[#allocation9 + $0x2]] }
  0x76   : > { %960 = vmatpush.msrb.mxu2 %v938_v17  ;;  %v800_v25 = vmul.f32 %v2494_v29, %v799_v46  ;;  %v774_v31 = vmul.f32 %v2460_v11, %v773_v61  ;;  %v778_v44 = vmul.f32 %v2491_v28, %v777_v62  ;;  %v784_v18 = vmul.f32 %v2494_v29, %v783_v63  ;;  %s2837_s29 = sld [smem:[#allocation11 + $0x203]] }
  0x77   : > { %v632_v59 = vrot.slane %v626_v5, 7  ;;  %1780 = vmatmul.msk.f32.gmra.mxu3 %vm531_vm6, %v626_v5  ;;  %v473_v45 = vadd.f32 %v471_v8, %v465_v14  ;;  %v796_v19 = vadd.f32 %v794_v9, %v790_v4  ;;  %v868_v23 = vmul.f32 %v2767_v1, %v2499_v32  ;;  %s2844_s16 = sld [smem:[#allocation11 + $0x204]] }
  0x78   : > { %987 = vmatpush.msrb.mxu3 %v922_v13  ;;  %v780_v46 = vadd.f32 %v778_v44, %v774_v31  ;;  %v870_v61 = vmul.f32 %v2767_v1, %v2509_v38  ;;  %v2800_v62 = vstv %s2717_s28  ;;  %v2803_v63 = vstv %s2725_s9  ;;  %s2851_s28 = sld [smem:[#allocation11 + $0x205]] }
  0x79   : > { %v633_v26 = vsel %vm493_vm7, %v631_v36, %v632_v59  ;;  %v481_v27 = vadd.f32 %v479_v2, %v473_v45  ;;  %v802_v42 = vadd.f32 %v800_v25, %v796_v19  ;;  %v873_v30 = vmul.f32 %v2502_v33, %v2800_v62  ;;  %s2862_s9 = sld [smem:[#allocation11 + $0x200]] }
  0x7a   : > { %1778 = vmatmul.msk.f32.gmra.mxu2 %vm531_vm6, %v633_v26  ;;  %v786_v43 = vadd.f32 %v784_v18, %v780_v46  ;;  %v877_v34 = vmul.f32 %v2512_v39, %v2800_v62  ;;  %v881_v24 = vmul.f32 %v2527_v47, %v2803_v63  ;;  %v885_v36 = vmul.f32 %v2537_v51, %v2803_v63 }
  0x7b   : > { %v487_v35 = vadd.f32 %v2681_v41, %v481_v27  ;;  %824 = vmatpush.msrb.mxu0 %v802_v42  ;;  %v875_v57 = vadd.f32 %v873_v30, %v868_v23  ;;  %v2825_v40 = vstv %s2732_s30  ;;  %v2828_v58 = vstv %s2743_s19  ;;  %s2867_s30 = sld [smem:[#allocation11 + $0x201]] }
  0x7c   : > { %851 = vmatpush.msrb.mxu1 %v786_v43  ;;  %v878_v3 = vadd.f32 %v877_v34, %v870_v61  ;;  %v889_v49 = vmul.f32 %v2530_v48, %v2825_v40  ;;  %v893_v41 = vmul.f32 %v2540_v52, %v2825_v40  ;;  %v1197_v50 = vstv %s2751_s13  ;;  %s2881_s19 = sld [smem:[#allocation11 + $0x202]] }
  0x7d   : > { %v495_v6 = vrot.slane %v487_v35, 7  ;;  %1765 = vmatmul.msk.f32.gmra.mxu1 %vm531_vm6, %v487_v35  ;;  %v883_v53 = vadd.f32 %v881_v24, %v875_v57  ;;  %v1199_v7 = vmul.f32 %v2467_v16, %v1197_v50  ;;  %v1201_v54 = vstv %s2761_s11  ;;  %s2973_s13 = sld [smem:[#allocation11 + $0x383]] }
  0x7e   : > { %v886_v12 = vadd.f32 %v885_v36, %v878_v3  ;;  %v1203_v15 = vmul.f32 %v2476_v20, %v1201_v54  ;;  %v1207_v60 = vstv %s2769_s20  ;;  %v1181_v17 = vstv %s2776_s2  ;;  %s2983_s11 = sld [smem:[#allocation11 + $0x384]] }
  0x7f   : > { %v496_v8 = vsel %vm493_vm7, %v494_v37, %v495_v6  ;;  %v891_v2 = vadd.f32 %v889_v49, %v883_v53  ;;  %v1209_v4 = vmul.f32 %v2478_v21, %v1207_v60  ;;  %v1183_v5 = vmul.f32 %v2467_v16, %v1181_v17  ;;  %s2991_s20 = sld [smem:[#allocation11 + $0x385]] }
  0x80   : > { %1763 = vmatmul.msk.f32.gmra.mxu0 %vm531_vm6, %v496_v8  ;;  %v894_v13 = vadd.f32 %v893_v41, %v886_v12  ;;  %v1205_v14 = vadd.f32 %v1203_v15, %v1199_v7  ;;  %v1185_v9 = vstv %s2782_s0  ;;  %v1191_v25 = vstv %s2790_s3  ;;  %s2998_s2 = sld [smem:[#allocation11 + $0x380]] }
  0x81   : > { %v2870_v22 = vadd.f32 %v2828_v58, %v891_v2  ;;  %v1187_v37 = vmul.f32 %v2476_v20, %v1185_v9  ;;  %v1193_v31 = vmul.f32 %v2478_v21, %v1191_v25  ;;  %v2879_v44 = vstv %s2795_s7  ;;  %s2930_s7 = sld [smem:[#allocation8 + $0x280]] }
  0x82   : > { %v899_v18 = vadd.f32 %v2828_v58, %v894_v13  ;;  %v1211_v59 = vadd.f32 %v1209_v4, %v1205_v14  ;;  %v732_v45 = vmul.f32 %v2879_v44, %v2499_v32  ;;  %v734_v19 = vmul.f32 %v2879_v44, %v2509_v38  ;;  %s3002_s0 = sld [smem:[#allocation11 + $0x381]] }
  0x83   : > { %v903_v23 = vrot.slane %v2870_v22, 7  ;;  %1815 = vmatmul.msk.f32.vlgmr.msrb.gmra.mxu3 %vm531_vm6, %v2870_v22  ;;  %v1189_v46 = vadd.f32 %v1187_v37, %v1183_v5  ;;  %v2892_v61 = vstv %s2805_s12  ;;  %v2895_v26 = vstv %s2812_s14  ;;  %s2939_s12 = sld [smem:[#allocation8 + $0x281]] }
  0x84   : > { %v900_v27 = vmul.f32 0.0, %v899_v18  ;;  %1231 = vmatpush.msra.mxu2 %v1211_v59  ;;  %v737_v42 = vmul.f32 %v2502_v33, %v2892_v61  ;;  %v741_v30 = vmul.f32 %v2512_v39, %v2892_v61  ;;  %v745_v43 = vmul.f32 %v2527_v47, %v2895_v26  ;;  %s2947_s14 = sld [smem:[#allocation8 + $0x282]] }
  0x85   : > { %v1195_v34 = vadd.f32 %v1193_v31, %v1189_v46  ;;  %v749_v24 = vmul.f32 %v2537_v51, %v2895_v26  ;;  %v2906_v36 = vstv %s2821_s18  ;;  %v2909_v35 = vstv %s2830_s17  ;;  %s2954_s18 = sld [smem:[#allocation8 + $0x283]] }
  0x86   : > { %v907_v57 = vsel %vm493_vm7, %v900_v27, %v903_v23  ;;  %v739_v3 = vadd.f32 %v737_v42, %v732_v45  ;;  %v742_v49 = vadd.f32 %v741_v30, %v734_v19  ;;  %v753_v41 = vmul.f32 %v2530_v48, %v2906_v36  ;;  %s2965_s17 = sld [smem:[#allocation9 + $0x5]] }
  0x87   : > { %1813 = vmatmul.msk.f32.vlgmr.msrb.gmra.mxu2 %vm531_vm6, %v907_v57  ;;  %1258 = vmatpush.msra.mxu3 %v1195_v34  ;;  %v757_v6 = vmul.f32 %v2540_v52, %v2906_v36  ;;  %v1061_v53 = vstv %s2837_s29  ;;  %v1065_v7 = vstv %s2844_s16  ;;  %v1071_v12 = vstv %s2851_s28  ;;  %s3010_s3 = sld [smem:[#allocation11 + $0x382]] }
  0x88   : > { %v747_v15 = vadd.f32 %v745_v43, %v739_v3  ;;  %v750_v8 = vadd.f32 %v749_v24, %v742_v49  ;;  %v1063_v2 = vmul.f32 %v2467_v16, %v1061_v53  ;;  %v1067_v4 = vmul.f32 %v2476_v20, %v1065_v7  ;;  %s3015_s29 = sld [smem:[#allocation8 + $0x200]] }
  0x89   : > { %v1073_v5 = vmul.f32 %v2478_v21, %v1071_v12  ;;  %v1045_v13 = vstv %s2862_s9  ;;  %v1049_v14 = vstv %s2867_s30  ;;  %v1055_v37 = vstv %s2881_s19  ;;  %s3025_s16 = sld [smem:[#allocation8 + $0x201]] }
  0x8a   : > { %v755_v31 = vadd.f32 %v753_v41, %v747_v15  ;;  %v758_v18 = vadd.f32 %v757_v6, %v750_v8  ;;  %v1069_v59 = vadd.f32 %v1067_v4, %v1063_v2  ;;  %v1047_v45 = vmul.f32 %v2467_v16, %v1045_v13  ;;  %s3032_s28 = sld [smem:[#allocation8 + $0x202]] }
  0x8b   : > { %v1051_v19 = vmul.f32 %v2476_v20, %v1049_v14  ;;  %v1057_v46 = vmul.f32 %v2478_v21, %v1055_v37  ;;  %v869_v27 = vmul.f32 %v2767_v1, %v2691_v55  ;;  %v874_v42 = vmul.f32 %v2694_v56, %v2800_v62  ;;  %s3041_s9 = sld [smem:[#allocation8 + $0x203]] }
  0x8c   : > { %v2942_v30 = vadd.f32 %v2909_v35, %v755_v31  ;;  %v763_v43 = vadd.f32 %v2909_v35, %v758_v18  ;;  %v1075_v34 = vadd.f32 %v1073_v5, %v1069_v59  ;;  %v882_v24 = vmul.f32 %v2703_v0, %v2803_v63  ;;  %s3050_s30 = sld [smem:[#allocation9 + $0x4]] }
  0x8d   : > { %v1053_v1 = vadd.f32 %v1051_v19, %v1047_v45  ;;  %v876_v57 = vadd.f32 %v874_v42, %v869_v27  ;;  %v890_v62 = vmul.f32 %v2709_v10, %v2825_v40  ;;  %v1198_v3 = vmul.f32 %v2460_v11, %v1197_v50  ;;  %s3057_s19 = sld [smem:[#allocation11 + $0x303]] }
  0x8e   : > { %v764_v49 = vmul.f32 0.0, %v763_v43  ;;  %v767_v41 = vrot.slane %v2942_v30, 7  ;;  %1797 = vmatmul.msk.f32.vlgmr.msrb.gmra.mxu1 %vm531_vm6, %v2942_v30  ;;  %1095 = vmatpush.msra.mxu0 %v1075_v34  ;;  %v1202_v63 = vmul.f32 %v2491_v28, %v1201_v54  ;;  %v1208_v6 = vmul.f32 %v2494_v29, %v1207_v60 }
  0x8f   : > { %v1059_v40 = vadd.f32 %v1057_v46, %v1053_v1  ;;  %v884_v50 = vadd.f32 %v882_v24, %v876_v57  ;;  %v1182_v15 = vmul.f32 %v2460_v11, %v1181_v17  ;;  %v1186_v8 = vmul.f32 %v2491_v28, %v1185_v9 }
  0x90   : > { %v771_v54 = vsel %vm493_vm7, %v764_v49, %v767_v41  ;;  %v1204_v2 = vadd.f32 %v1202_v63, %v1198_v3  ;;  %v1192_v60 = vmul.f32 %v2494_v29, %v1191_v25  ;;  %v733_v4 = vmul.f32 %v2879_v44, %v2691_v55 }
  0x91   : > { %1795 = vmatmul.msk.f32.vlgmr.msrb.gmra.mxu0 %vm531_vm6, %v771_v54  ;;  %1122 = vmatpush.msra.mxu1 %v1059_v40  ;;  %v892_v17 = vadd.f32 %v890_v62, %v884_v50  ;;  %v1188_v9 = vadd.f32 %v1186_v8, %v1182_v15  ;;  %v738_v5 = vmul.f32 %v2694_v56, %v2892_v61  ;;  %v2989_v31 = vstv %s2930_s7  ;;  %s3064_s7 = sld [smem:[#allocation11 + $0x304]] }
  0x92   : > { %v1210_v18 = vadd.f32 %v1208_v6, %v1204_v2  ;;  %v746_v25 = vmul.f32 %v2703_v0, %v2895_v26  ;;  %v754_v44 = vmul.f32 %v2709_v10, %v2906_v36  ;;  %v1062_v59 = vmul.f32 %v2460_v11, %v1061_v53 }
  0x93   : > { %v898_v45 = vadd.f32 %v2828_v58, %v892_v17  ;;  %v1194_v19 = vadd.f32 %v1192_v60, %v1188_v9  ;;  %v740_v46 = vadd.f32 %v738_v5, %v733_v4  ;;  %v1066_v61 = vmul.f32 %v2491_v28, %v1065_v7 }
  0x94   : > { %1232 = vmatpush.msra.mxu2 %v1210_v18  ;;  %v1072_v26 = vmul.f32 %v2494_v29, %v1071_v12  ;;  %v1046_v36 = vmul.f32 %v2460_v11, %v1045_v13  ;;  %v1050_v53 = vmul.f32 %v2491_v28, %v1049_v14  ;;  %v1056_v27 = vmul.f32 %v2494_v29, %v1055_v37 }
  0x95   : > { %v904_v58 = vrot.slane %v898_v45, 7  ;;  %1816 = vmatmul.msk.f32.gmra.mxu3 %vm531_vm6, %v898_v45  ;;  %v748_v7 = vadd.f32 %v746_v25, %v740_v46  ;;  %v1068_v42 = vadd.f32 %v1066_v61, %v1062_v59  ;;  %v1140_v43 = vmul.f32 %v2989_v31, %v2499_v32 }
  0x96   : > { %1259 = vmatpush.msra.mxu3 %v1194_v19  ;;  %v1052_v12 = vadd.f32 %v1050_v53, %v1046_v36  ;;  %v1142_v13 = vmul.f32 %v2989_v31, %v2509_v38  ;;  %v3020_v14 = vstv %s2939_s12  ;;  %v3023_v37 = vstv %s2947_s14  ;;  %s3071_s12 = sld [smem:[#allocation11 + $0x305]] }
  0x97   : > { %v905_v34 = vsel %vm493_vm7, %v903_v23, %v904_v58  ;;  %v756_v24 = vadd.f32 %v754_v44, %v748_v7  ;;  %v1074_v1 = vadd.f32 %v1072_v26, %v1068_v42  ;;  %v1145_v57 = vmul.f32 %v2502_v33, %v3020_v14  ;;  %s3082_s14 = sld [smem:[#allocation11 + $0x300]] }
  0x98   : > { %1814 = vmatmul.msk.f32.gmra.mxu2 %vm531_vm6, %v905_v34  ;;  %v1058_v62 = vadd.f32 %v1056_v27, %v1052_v12  ;;  %v1149_v3 = vmul.f32 %v2512_v39, %v3020_v14  ;;  %v1153_v22 = vmul.f32 %v2527_v47, %v3023_v37  ;;  %v1157_v23 = vmul.f32 %v2537_v51, %v3023_v37 }
  0x99   : > { %v762_v49 = vadd.f32 %v2909_v35, %v756_v24  ;;  %1096 = vmatpush.msra.mxu0 %v1074_v1  ;;  %v1147_v63 = vadd.f32 %v1145_v57, %v1140_v43  ;;  %v3045_v6 = vstv %s2954_s18  ;;  %v3048_v40 = vstv %s2965_s17  ;;  %s3087_s18 = sld [smem:[#allocation11 + $0x301]] }
  0x9a   : > { %1123 = vmatpush.msra.mxu1 %v1058_v62  ;;  %v1150_v50 = vadd.f32 %v1149_v3, %v1142_v13  ;;  %v1161_v15 = vmul.f32 %v2530_v48, %v3045_v6  ;;  %v1165_v35 = vmul.f32 %v2540_v52, %v3045_v6  ;;  %v1469_v8 = vstv %s2973_s13  ;;  %s3101_s17 = sld [smem:[#allocation11 + $0x302]] }
  0x9b   : > { %v768_v54 = vrot.slane %v762_v49, 7  ;;  %1798 = vmatmul.msk.f32.gmra.mxu1 %vm531_vm6, %v762_v49  ;;  %v1155_v2 = vadd.f32 %v1153_v22, %v1147_v63  ;;  %v1471_v60 = vmul.f32 %v2467_v16, %v1469_v8  ;;  %v1473_v4 = vstv %s2983_s11  ;;  %s3187_s13 = sld [smem:[#allocation8 + $0x383]] }
  0x9c   : > { %v1158_v17 = vadd.f32 %v1157_v23, %v1150_v50  ;;  %v1475_v9 = vmul.f32 %v2476_v20, %v1473_v4  ;;  %v1479_v5 = vstv %s2991_s20  ;;  %v1453_v18 = vstv %s2998_s2  ;;  %s3197_s11 = sld [smem:[#allocation9 + $0x7]] }
  0x9d   : > { %v769_v25 = vsel %vm493_vm7, %v767_v41, %v768_v54  ;;  %v1163_v44 = vadd.f32 %v1161_v15, %v1155_v2  ;;  %v1481_v59 = vmul.f32 %v2478_v21, %v1479_v5  ;;  %v1455_v45 = vmul.f32 %v2467_v16, %v1453_v18  ;;  %s3205_s20 = sld [smem:[#allocation8 + $0x300]] }
  0x9e   : > { %1796 = vmatmul.msk.f32.gmra.mxu0 %vm531_vm6, %v769_v25  ;;  %v1166_v19 = vadd.f32 %v1165_v35, %v1158_v17  ;;  %v1477_v46 = vadd.f32 %v1475_v9, %v1471_v60  ;;  %v1457_v61 = vstv %s3002_s0  ;;  %v1463_v26 = vstv %s3010_s3  ;;  %s3212_s2 = sld [smem:[#allocation8 + $0x301]] }
  0x9f   : > { %v3090_v30 = vadd.f32 %v3048_v40, %v1163_v44  ;;  %v1459_v41 = vmul.f32 %v2476_v20, %v1457_v61  ;;  %v1465_v36 = vmul.f32 %v2478_v21, %v1463_v26  ;;  %v3099_v53 = vstv %s3015_s29  ;;  %s3148_s29 = sld [smem:[#allocation8 + $0x380]] }
  0xa0   : > { %v1171_v27 = vadd.f32 %v3048_v40, %v1166_v19  ;;  %v1483_v58 = vadd.f32 %v1481_v59, %v1477_v46  ;;  %v1004_v7 = vmul.f32 %v3099_v53, %v2499_v32  ;;  %v1006_v42 = vmul.f32 %v3099_v53, %v2509_v38  ;;  %s3216_s0 = sld [smem:[#allocation8 + $0x302]] }
  0xa1   : > { %v1175_v43 = vrot.slane %v3090_v30, 7  ;;  %1851 = vmatmul.msk.f32.vlgmr.msra.gmra.mxu3 %vm531_vm6, %v3090_v30  ;;  %v1461_v12 = vadd.f32 %v1459_v41, %v1455_v45  ;;  %v3112_v13 = vstv %s3025_s16  ;;  %v3115_v34 = vstv %s3032_s28  ;;  %s3168_s16 = sld [smem:[#allocation8 + $0x381]] }
  0xa2   : > { %v1172_v24 = vmul.f32 0.0, %v1171_v27  ;;  %1503 = vmatpush.msrb.mxu2 %v1483_v58  ;;  %v1009_v32 = vmul.f32 %v2502_v33, %v3112_v13  ;;  %v1013_v38 = vmul.f32 %v2512_v39, %v3112_v13  ;;  %v1017_v1 = vmul.f32 %v2527_v47, %v3115_v34  ;;  %s3179_s28 = sld [smem:[#allocation8 + $0x382]] }
  0xa3   : > { %v1467_v57 = vadd.f32 %v1465_v36, %v1461_v12  ;;  %v1021_v62 = vmul.f32 %v2537_v51, %v3115_v34  ;;  %v3126_v3 = vstv %s3041_s9  ;;  %v3129_v22 = vstv %s3050_s30  ;;  %s3222_s3 = sld [smem:[#allocation8 + $0x303]] }
  0xa4   : > { %v1179_v33 = vsel %vm493_vm7, %v1172_v24, %v1175_v43  ;;  %v1011_v23 = vadd.f32 %v1009_v32, %v1004_v7  ;;  %v1014_v39 = vadd.f32 %v1013_v38, %v1006_v42  ;;  %v1025_v47 = vmul.f32 %v2530_v48, %v3126_v3  ;;  %s3239_s9 = sld [smem:[#allocation9 + $0x6]] }
  0xa5   : > { %1849 = vmatmul.msk.f32.vlgmr.msra.gmra.mxu2 %vm531_vm6, %v1179_v33  ;;  %1530 = vmatpush.msrb.mxu3 %v1467_v57  ;;  %v1029_v51 = vmul.f32 %v2540_v52, %v3126_v3  ;;  %v1333_v49 = vstv %s3057_s19  ;;  %v1337_v63 = vstv %s3064_s7  ;;  %v1343_v50 = vstv %s3071_s12  ;;  %s587_s30 = sld [smem:[#allocation12]] }
  0xa6   : > { %v1019_v15 = vadd.f32 %v1017_v1, %v1011_v23  ;;  %v1022_v35 = vadd.f32 %v1021_v62, %v1014_v39  ;;  %v1335_v54 = vmul.f32 %v2467_v16, %v1333_v49  ;;  %v1339_v2 = vmul.f32 %v2476_v20, %v1337_v63  ;;  %s1817_s7 = sld [smem:[#allocation12 + $0x3]] }
  0xa7   : > { %v1345_v60 = vmul.f32 %v2478_v21, %v1343_v50  ;;  %v1317_v17 = vstv %s3082_s14  ;;  %v1321_v9 = vstv %s3087_s18  ;;  %v1327_v48 = vstv %s3101_s17  ;;  %s1799_s12 = sld [smem:[#allocation12 + $0x2]] }
  0xa8   : > { %v1027_v25 = vadd.f32 %v1025_v47, %v1019_v15  ;;  %v1030_v44 = vadd.f32 %v1029_v51, %v1022_v35  ;;  %v1341_v52 = vadd.f32 %v1339_v2, %v1335_v54  ;;  %v1319_v59 = vmul.f32 %v2467_v16, %v1317_v17  ;;  %v2014_v54 = vld [vmem:[%s2418_s10] sm:$0xff]  ;;  %s1853_s14 = sld [smem:[#allocation12 + $0x5]] }
  0xa9   : > { %v1323_v45 = vmul.f32 %v2476_v20, %v1321_v9  ;;  %v1329_v19 = vmul.f32 %v2478_v21, %v1327_v48  ;;  %v1141_v46 = vmul.f32 %v2989_v31, %v2691_v55  ;;  %v1146_v41 = vmul.f32 %v2694_v56, %v3020_v14  ;;  %s1835_s18 = sld [smem:[#allocation12 + $0x4]] }
  0xaa   : > { %v3158_v36 = vadd.f32 %v3129_v22, %v1027_v25  ;;  %v1035_v27 = vadd.f32 %v3129_v22, %v1030_v44  ;;  %v1347_v58 = vadd.f32 %v1345_v60, %v1341_v52  ;;  %v1154_v16 = vmul.f32 %v2703_v0, %v3023_v37  ;;  %v2016_v25 = vld [vmem:[%s2418_s10 + $0x10] sm:$0xff]  ;;  %s1871_s17 = sld [smem:[#allocation12 + $0x6]] }
  0xab   : > { %v1325_v20 = vadd.f32 %v1323_v45, %v1319_v59  ;;  %v1148_v21 = vadd.f32 %v1146_v41, %v1141_v46  ;;  %v1162_v31 = vmul.f32 %v2709_v10, %v3045_v6  ;;  %v1470_v7 = vmul.f32 %v2460_v11, %v1469_v8  ;;  %v2017_v59 = vld [vmem:[%s2426_s5 + $0xf] sm:$0x1]  ;;  %v2019_v41 = vld [vmem:[%s2426_s5 + $0x17] sm:$0x1] }
  0xac   : > { %v1036_v14 = vmul.f32 0.0, %v1035_v27  ;;  %v1039_v42 = vrot.slane %v3158_v36, 7  ;;  %1833 = vmatmul.msk.f32.vlgmr.msra.gmra.mxu1 %vm531_vm6, %v3158_v36  ;;  %1367 = vmatpush.msrb.mxu0 %v1347_v58  ;;  %v1474_v37 = vmul.f32 %v2491_v28, %v1473_v4  ;;  %v1480_v12 = vmul.f32 %v2494_v29, %v1479_v5 }
  0xad   : > { %v1331_v6 = vadd.f32 %v1329_v19, %v1325_v20  ;;  %v1156_v8 = vadd.f32 %v1154_v16, %v1148_v21  ;;  %v1454_v24 = vmul.f32 %v2460_v11, %v1453_v18  ;;  %v1458_v32 = vmul.f32 %v2491_v28, %v1457_v61  ;;  %v2018_v19 = vld [vmem:[%s2418_s10 + $0x20] sm:$0xff]  ;;  %v2020_v21 = vld [vmem:[%s2418_s10 + $0x30] sm:$0xff]  ;;  %s1781_s10 = sld [smem:[#allocation12 + $0x1]] }
  0xae   : > { %v1043_v4 = vsel %vm493_vm7, %v1036_v14, %v1039_v42  ;;  %v1476_v38 = vadd.f32 %v1474_v37, %v1470_v7  ;;  %v1464_v5 = vmul.f32 %v2494_v29, %v1463_v26  ;;  %v1005_v1 = vmul.f32 %v3099_v53, %v2691_v55  ;;  %v2021_v7 = vld [vmem:[%s2426_s5 + $0x1f] sm:$0x1] }
  0xaf   : > { %1831 = vmatmul.msk.f32.vlgmr.msra.gmra.mxu0 %vm531_vm6, %v1043_v4  ;;  %1394 = vmatpush.msrb.mxu1 %v1331_v6  ;;  %v1164_v18 = vadd.f32 %v1162_v31, %v1156_v8  ;;  %v1460_v61 = vadd.f32 %v1458_v32, %v1454_v24  ;;  %v1010_v57 = vmul.f32 %v2694_v56, %v3112_v13  ;;  %v3203_v62 = vstv %s3148_s29  ;;  %s1889_s29 = sld [smem:[#allocation12 + $0x7]] }
  0xb0   : > { %v1482_v33 = vadd.f32 %v1480_v12, %v1476_v38  ;;  %v1018_v26 = vmul.f32 %v2703_v0, %v3115_v34  ;;  %v1026_v53 = vmul.f32 %v2709_v10, %v3126_v3  ;;  %v1334_v23 = vmul.f32 %v2460_v11, %v1333_v49 }
  0xb1   : > { %v1170_v39 = vadd.f32 %v3048_v40, %v1164_v18  ;;  %v1466_v47 = vadd.f32 %v1464_v5, %v1460_v61  ;;  %v1012_v13 = vadd.f32 %v1010_v57, %v1005_v1  ;;  %v1338_v51 = vmul.f32 %v2491_v28, %v1337_v63 }
  0xb2   : > { %1504 = vmatpush.msrb.mxu2 %v1482_v33  ;;  %v1344_v34 = vmul.f32 %v2494_v29, %v1343_v50  ;;  %v1318_v3 = vmul.f32 %v2460_v11, %v1317_v17  ;;  %v1322_v49 = vmul.f32 %v2491_v28, %v1321_v9  ;;  %v1328_v15 = vmul.f32 %v2494_v29, %v1327_v48  ;;  %v2015_v11 = vld [vmem:[%s2426_s5 + $0x7] sm:$0x1]  ;;  %s1738_s5 = sshll.u32 %s2414_s4, 7 }
  0xb3   : > { %v1176_v40 = vrot.slane %v1170_v39, 7  ;;  %1852 = vmatmul.msk.f32.gmra.mxu3 %vm531_vm6, %v1170_v39  ;;  %v1020_v63 = vadd.f32 %v1018_v26, %v1012_v13  ;;  %v1340_v35 = vadd.f32 %v1338_v51, %v1334_v23  ;;  %v1412_v2 = vmul.f32 %v2014_v54, %v3203_v62  ;;  %s3278_s19 = scalar_lea.vmem [#allocation14], %s1738_s5  ;;  %s2162_s5 = scalar_lea.hbm %s3357_s6, 256 }
  0xb4   : > { %1531 = vmatpush.msrb.mxu3 %v1466_v47  ;;  %v1324_v50 = vadd.f32 %v1322_v49, %v1318_v3  ;;  %v1414_v28 = vmul.f32 %v2015_v11, %v3203_v62  ;;  %v1416_v29 = vstv %s3168_s16  ;;  %v1424_v60 = vstv %s3179_s28  ;;  %s1899_s16 = sshll.u32 %s2232_s24, 7  ;;  %s1547_s24 = scalar_lea.sflag [#allocation4], %s2414_s4 }
  0xb5   : > { %v1177_v17 = vsel %vm493_vm7, %v1175_v43, %v1176_v40  ;;  %v1028_v9 = vadd.f32 %v1026_v53, %v1020_v63  ;;  %v1346_v48 = vadd.f32 %v1344_v34, %v1340_v35  ;;  %v1417_v44 = vmul.f32 %v2016_v25, %v1416_v29 }
  0xb6   : > { %1850 = vmatmul.msk.f32.gmra.mxu2 %vm531_vm6, %v1177_v17  ;;  %v1330_v52 = vadd.f32 %v1328_v15, %v1324_v50  ;;  %v1421_v45 = vmul.f32 %v2017_v59, %v1416_v29  ;;  %v1425_v46 = vmul.f32 %v2018_v19, %v1424_v60  ;;  %v1429_v30 = vmul.f32 %v2019_v41, %v1424_v60 }
  0xb7   : > { %v1034_v43 = vadd.f32 %v3129_v22, %v1028_v9  ;;  %1368 = vmatpush.msrb.mxu0 %v1346_v48  ;;  %v1419_v27 = vadd.f32 %v1417_v44, %v1412_v2  ;;  %v1432_v58 = vstv %s3187_s13  ;;  %v1440_v16 = vstv %s3197_s11  ;;  %s1560_s11 = scalar_lea.hbm %s3357_s6, %s1899_s16 }
  0xb8   : > { %1395 = vmatpush.msrb.mxu1 %v1330_v52  ;;  %v1422_v20 = vadd.f32 %v1421_v45, %v1414_v28  ;;  %v1433_v31 = vmul.f32 %v2020_v21, %v1432_v58  ;;  %v1437_v14 = vmul.f32 %v2021_v7, %v1432_v58  ;;  %v1275_v37 = vstv %s3205_s20  ;;  %s1561_s20 = sshll.u32 %s3278_s19, 4  ;;  %s1562_s20 = int_to_ptr.vmem [resolvable:$true] %s1561_s20 }
  0xb9   : > { %v1040_v12 = vrot.slane %v1034_v43, 7  ;;  %1834 = vmatmul.msk.f32.gmra.mxu1 %vm531_vm6, %v1034_v43  ;;  %v1427_v6 = vadd.f32 %v1425_v46, %v1419_v27  ;;  %v1276_v8 = vmul.f32 %v2014_v54, %v1275_v37  ;;  %v1278_v22 = vmul.f32 %v2015_v11, %v1275_v37 }
  0xba   : > { %v1430_v24 = vadd.f32 %v1429_v30, %v1422_v20  ;;  %v1280_v32 = vstv %s3212_s2  ;;  %v1288_v4 = vstv %s3216_s0  ;;  %v1296_v38 = vstv %s3222_s3  ;;  %s1563_s2 = sshll.u32 %s1560_s11, 4  ;;  %s1564_s2 = int_to_ptr.hbm [resolvable:$true] %s1563_s2 }
  0xbb   : > { %v1041_v5 = vsel %vm493_vm7, %v1039_v42, %v1040_v12  ;;  %v1435_v1 = vadd.f32 %v1433_v31, %v1427_v6  ;;  %v1281_v18 = vmul.f32 %v2016_v25, %v1280_v32  ;;  %v1285_v61 = vmul.f32 %v2017_v59, %v1280_v32  ;;  %s2156_s0 = sshra.s32 %s1564_s2, 4  ;;  %s2157_s0 = int_to_ptr.hbm [resolvable:$true] %s2156_s0 }
  0xbc   : > { %1832 = vmatmul.msk.f32.gmra.mxu0 %vm531_vm6, %v1041_v5  ;;  %v1438_v57 = vadd.f32 %v1437_v14, %v1430_v24  ;;  %v1289_v33 = vmul.f32 %v2018_v19, %v1288_v4  ;;  %v1293_v26 = vmul.f32 %v2019_v41, %v1288_v4  ;;  %v1297_v53 = vmul.f32 %v2020_v21, %v1296_v38  ;;  %s2158_s3 = scalar_lea.hbm %s2157_s0, 128  ;;  %p2163_p11 = scmp.lt.s32.totalorder %s2157_s0, %s3357_s6 }
  0xbd   : > { %v1441_v23 = vadd.f32 %v1440_v16, %v1435_v1  ;;  %v1283_v39 = vadd.f32 %v1281_v18, %v1276_v8  ;;  %v1286_v47 = vadd.f32 %v1285_v61, %v1278_v22  ;;  %v1301_v13 = vmul.f32 %v2021_v7, %v1296_v38  ;;  %p2159_p1 = scmp.ne.s32.totalorder %s2157_s0, %s2158_s3  ;;  %p2164_p12 = scmp.lt.s32.totalorder %s2162_s5, %s2158_s3 }
  0xbe   : > { %v1443_v51 = vadd.f32 %v1440_v16, %v1438_v57  ;;  %v1304_v34 = vstv %s3239_s9  ;;  %v1413_v36 = vmul.f32 %v3203_v62, %v2691_v55  ;;  %v1418_v42 = vmul.f32 %v2694_v56, %v1416_v29 }
  0xbf   : > { %v1447_v3 = vrot.slane %v1441_v23, 7  ;;  %1887 = vmatmul.msk.f32.vlgmr.msrb.gmra.mxu3 %vm531_vm6, %v1441_v23  ;;  %v1291_v49 = vadd.f32 %v1289_v33, %v1283_v39  ;;  %v1294_v15 = vadd.f32 %v1293_v26, %v1286_v47  ;;  %v1426_v40 = vmul.f32 %v2703_v0, %v1424_v60  ;;  %p2160_p4 = pnand %p2159_p1, %p2376_p7  ;;  %p2165_p13 = por %p2164_p12, %p2163_p11 }
  0xc0   : > { %v1444_v63 = vmul.f32 0.0, %v1443_v51  ;;  %v1420_v35 = vadd.f32 %v1418_v42, %v1413_v36  ;;  %v1434_v54 = vmul.f32 %v2709_v10, %v1432_v58  ;;  %v1277_v2 = vmul.f32 %v1275_v37, %v2691_v55 }
  0xc1   : > { %v1299_v50 = vadd.f32 %v1297_v53, %v1291_v49  ;;  %v1302_v11 = vadd.f32 %v1301_v13, %v1294_v15  ;;  %v1282_v28 = vmul.f32 %v2694_v56, %v1280_v32  ;;  %v1290_v62 = vmul.f32 %v2703_v0, %v1288_v4  ;;  %p2161_p8 = pneg %p2160_p4 }
  0xc2   : > { %v1451_v29 = vsel %vm493_vm7, %v1444_v63, %v1447_v3  ;;  %v1428_v17 = vadd.f32 %v1426_v40, %v1420_v35  ;;  %v1298_v25 = vmul.f32 %v2709_v10, %v1296_v38  ;;  %v724_v58 = vstv %s1781_s10 }
  0xc3   : > { %1885 = vmatmul.msk.f32.vlgmr.msrb.gmra.mxu2 %vm531_vm6, %v1451_v29  ;;  %v1305_v9 = vadd.f32 %v1304_v34, %v1299_v50  ;;  %v1307_v48 = vadd.f32 %v1304_v34, %v1302_v11  ;;  %v1284_v60 = vadd.f32 %v1282_v28, %v1277_v2  ;;  %v588_v7 = vstv %s587_s30  ;;  %p2166_p0 = pnand %p2165_p13, %p2161_p8 }
  0xc4   : > { %v1436_v44 = vadd.f32 %v1434_v54, %v1428_v17  ;;  %v996_v18 = vstv %s1817_s7  ;;  %v860_v53 = vstv %s1799_s12  ;;  %v1268_v63 = vstv %s1853_s14 }
  0xc5   : > { %v1308_v52 = vmul.f32 0.0, %v1307_v48  ;;  %v1311_v59 = vrot.slane %v1305_v9, 7  ;;  %1869 = vmatmul.msk.f32.vlgmr.msrb.gmra.mxu1 %vm531_vm6, %v1305_v9  ;;  %v1292_v55 = vadd.f32 %v1290_v62, %v1284_v60  ;;  %v1132_v11 = vstv %s1835_s18 }
  0xc6   : > { %v1442_v56 = vadd.f32 %v1440_v16, %v1436_v44 }
  0xc7   : > { %v1315_v0 = vsel %vm493_vm7, %v1308_v52, %v1311_v59  ;;  %v1300_v45 = vadd.f32 %v1298_v25, %v1292_v55 }
  0xc8   : > { %1867 = vmatmul.msk.f32.vlgmr.msrb.gmra.mxu0 %vm531_vm6, %v1315_v0  ;;  %v1448_v19 = vrot.slane %v1442_v56, 7  ;;  %1888 = vmatmul.msk.f32.gmra.mxu3 %vm531_vm6, %v1442_v56  ;;  %v1404_v0 = vstv %s1871_s17 }
  0xc9   : > { %v1306_v46 = vadd.f32 %v1304_v34, %v1300_v45 }
  0xca   : > { %v1449_v41 = vsel %vm493_vm7, %v1447_v3, %v1448_v19 }
  0xcb   : > { %1886 = vmatmul.msk.f32.gmra.mxu2 %vm531_vm6, %v1449_v41  ;;  %v1312_v10 = vrot.slane %v1306_v46, 7 }
  0xcd   : > { %v1313_v30 = vsel %vm493_vm7, %v1311_v59, %v1312_v10  ;;  %1870 = vmatmul.msk.f32.gmra.mxu1 %vm531_vm6, %v1306_v46  ;;  %v1540_v46 = vstv %s1889_s29 }
  0xd0   : > { %1868 = vmatmul.msk.f32.gmra.mxu0 %vm531_vm6, %v1313_v30 }
  0xe2   : > { %v717_v43 = vpop.f32.mrf.mxu3 }
  0xe6   : > { %v690_v27 = vpop.f32.mrf.mxu2 }
  0xe7   : > { %v718_v16 = vadd.f32 %v717_v43, %v690_v27 }
  0xe9   : > { %v725_v20 = vadd.f32 %v724_v58, %v718_v16 }
  0xeb   : > { %1782 = vst.msk [vmem:[%s3278_s19 + $0x10] sm:$0xff] %vm591_vm8, %v725_v20 }
  0xed   : > { %v581_v21 = vpop.f32.mrf.mxu1 }
  0xf0   : > { %v554_v31 = vpop.f32.mrf.mxu0 }
  0xf1   : > { %v582_v14 = vadd.f32 %v581_v21, %v554_v31 }
  0xf3   : > { %v589_v37 = vadd.f32 %v588_v7, %v582_v14 }
  0xf5   : > { %592 = vst.msk [vmem:[%s3278_s19] sm:$0xff] %vm591_vm8, %v589_v37 }
  0xfa   : > { %v584_v12 = vpop.f32.mrf.mxu1  ;;  %v720_v6 = vpop.f32.mrf.mxu3 }
  0xfd   : > { %v557_v8 = vpop.f32.mrf.mxu0  ;;  %v693_v22 = vpop.f32.mrf.mxu2 }
  0xfe   : > { %v585_v24 = vadd.f32 %v584_v12, %v557_v8  ;;  %v721_v32 = vadd.f32 %v720_v6, %v693_v22 }
 0x100   : > { %v590_v4 = vadd.f32 %v588_v7, %v585_v24  ;;  %v726_v38 = vadd.f32 %v724_v58, %v721_v32 }
 0x102   : > { %593 = vst.msk [vmem:[%s3278_s19 + $0x8] sm:$0xff] %vm591_vm8, %v590_v4 }
 0x103   : > { %1783 = vst.msk [vmem:[%s3278_s19 + $0x18] sm:$0xff] %vm591_vm8, %v726_v38 }
 0x106   : > { %v989_v5 = vpop.f32.mrf.mxu3 }
 0x10a   : > { %v962_v1 = vpop.f32.mrf.mxu2 }
 0x10b   : > { %v990_v61 = vadd.f32 %v989_v5, %v962_v1  ;;  %v853_v57 = vpop.f32.mrf.mxu1 }
 0x10d   : > { %v997_v33 = vadd.f32 %v996_v18, %v990_v61 }
 0x10e   : > { %v826_v26 = vpop.f32.mrf.mxu0 }
 0x10f   : > { %v854_v23 = vadd.f32 %v853_v57, %v826_v26  ;;  %1818 = vst.msk [vmem:[%s3278_s19 + $0x30] sm:$0xff] %vm591_vm8, %v997_v33 }
 0x111   : > { %v861_v39 = vadd.f32 %v860_v53, %v854_v23 }
 0x113   : > { %1800 = vst.msk [vmem:[%s3278_s19 + $0x20] sm:$0xff] %vm591_vm8, %v861_v39 }
 0x118   : > { %v856_v47 = vpop.f32.mrf.mxu1  ;;  %v992_v13 = vpop.f32.mrf.mxu3 }
 0x11b   : > { %v829_v51 = vpop.f32.mrf.mxu0  ;;  %v965_v34 = vpop.f32.mrf.mxu2 }
 0x11c   : > { %v857_v36 = vadd.f32 %v856_v47, %v829_v51  ;;  %v993_v42 = vadd.f32 %v992_v13, %v965_v34 }
 0x11e   : > { %v862_v3 = vadd.f32 %v860_v53, %v857_v36  ;;  %v998_v49 = vadd.f32 %v996_v18, %v993_v42 }
 0x120   : > { %1801 = vst.msk [vmem:[%s3278_s19 + $0x28] sm:$0xff] %vm591_vm8, %v862_v3 }
 0x121   : > { %1819 = vst.msk [vmem:[%s3278_s19 + $0x38] sm:$0xff] %vm591_vm8, %v998_v49 }
 0x124   : > { %v1261_v15 = vpop.f32.mrf.mxu3 }
 0x128   : > { %v1234_v40 = vpop.f32.mrf.mxu2 }
 0x129   : > { %v1262_v35 = vadd.f32 %v1261_v15, %v1234_v40  ;;  %v1125_v54 = vpop.f32.mrf.mxu1 }
 0x12b   : > { %v1269_v2 = vadd.f32 %v1268_v63, %v1262_v35 }
 0x12c   : > { %v1098_v50 = vpop.f32.mrf.mxu0 }
 0x12d   : > { %v1126_v28 = vadd.f32 %v1125_v54, %v1098_v50  ;;  %1854 = vst.msk [vmem:[%s3278_s19 + $0x50] sm:$0xff] %vm591_vm8, %v1269_v2 }
 0x12f   : > { %v1133_v62 = vadd.f32 %v1132_v11, %v1126_v28 }
 0x131   : > { %1836 = vst.msk [vmem:[%s3278_s19 + $0x40] sm:$0xff] %vm591_vm8, %v1133_v62 }
 0x136   : > { %v1128_v29 = vpop.f32.mrf.mxu1  ;;  %v1264_v17 = vpop.f32.mrf.mxu3 }
 0x139   : > { %v1101_v9 = vpop.f32.mrf.mxu0  ;;  %v1237_v48 = vpop.f32.mrf.mxu2 }
 0x13a   : > { %v1129_v60 = vadd.f32 %v1128_v29, %v1101_v9  ;;  %v1265_v25 = vadd.f32 %v1264_v17, %v1237_v48 }
 0x13c   : > { %v1134_v44 = vadd.f32 %v1132_v11, %v1129_v60  ;;  %v1270_v52 = vadd.f32 %v1268_v63, %v1265_v25 }
 0x13e   : > { %1837 = vst.msk [vmem:[%s3278_s19 + $0x48] sm:$0xff] %vm591_vm8, %v1134_v44 }
 0x13f   : > { %1855 = vst.msk [vmem:[%s3278_s19 + $0x58] sm:$0xff] %vm591_vm8, %v1270_v52 }
 0x142   : > { %v1397_v59 = vpop.f32.mrf.mxu1  ;;  %v1533_v55 = vpop.f32.mrf.mxu3 }
 0x145   : > { %v1370_v56 = vpop.f32.mrf.mxu0 }
 0x146   : > { %v1398_v45 = vadd.f32 %v1397_v59, %v1370_v56  ;;  %v1506_v19 = vpop.f32.mrf.mxu2 }
 0x147   : > { %v1534_v41 = vadd.f32 %v1533_v55, %v1506_v19 }
 0x148   : > { %v1405_v10 = vadd.f32 %v1404_v0, %v1398_v45 }
 0x149   : > { %v1541_v30 = vadd.f32 %v1540_v46, %v1534_v41 }
 0x14a   : > { %1872 = vst.msk [vmem:[%s3278_s19 + $0x60] sm:$0xff] %vm591_vm8, %v1405_v10  ;;  %v1400_v43 = vpop.f32.mrf.mxu1 }
 0x14b   : > { %1890 = vst.msk [vmem:[%s3278_s19 + $0x70] sm:$0xff] %vm591_vm8, %v1541_v30  ;;  %v1536_v27 = vpop.f32.mrf.mxu3 }
 0x14d   : > { %v1373_v58 = vpop.f32.mrf.mxu0 }
 0x14e   : > { %v1401_v16 = vadd.f32 %v1400_v43, %v1373_v58  ;;  %v1509_v20 = vpop.f32.mrf.mxu2 }
 0x14f   : > { %v1537_v21 = vadd.f32 %v1536_v27, %v1509_v20 }
 0x150   : > { %v1406_v31 = vadd.f32 %v1404_v0, %v1401_v16 }
 0x151   : > { %v1542_v7 = vadd.f32 %v1540_v46, %v1537_v21 }
 0x152   : > { %1873 = vst.msk [vmem:[%s3278_s19 + $0x68] sm:$0xff] %vm591_vm8, %v1406_v31 }
 0x153   : > { %1891 = vst.msk [vmem:[%s3278_s19 + $0x78] sm:$0xff] %vm591_vm8, %v1542_v7 }
 0x154   : > { %2169 = shalt.err (!%p2166_p0)
}
 0x155   : > { %s2250_s4 = smov 128   ;;  %s2251_s19 = smov 8  }
 0x156   : > { %1920 = dma.vmem_to_hbm [thread:$0]  (%p2376_p7), %s1562_s20, 2048, %s1564_s2, %s1547_s24, %s2250_s4, %s2250_s4, %s2251_s19  }
 0x157 PF: > { %s1578_s12 = sand.u32 1, %s2220_s21   ;;  %p1943_p3 = pnand %p1724_p9, %p2336_p6 }
 0x158   : > { %s1579_s14 = scalar_lea.sflag [#allocation4], %s1578_s12 }
 0x159   : > { %p1944_p5 = pneg %p1943_p3 }
 0x15b   : > { %2215 = dma.done.wait (%p1944_p5), %s1579_s14, 2048  }
 0x15c   : > { %2217 = vsyncadd (%p1944_p5), %s1579_s14, 4294965248  ;;  %s28_s26 = sadd.s32 1, %s2240_s26   ;;  %s3378_s15 = sld [smem:[#allocation21_spill]] }
 0x15d   : > { %p25_p10 = scmp.ge.s32.totalorder %s28_s26, 4   ;;  %s3379_s21 = smov %s2224_s22 }
 0x15e   : > { %s3380_s22 = smov %s2228_s23  ;;  %s3381_s23 = smov %s2388_s27 }
 0x15f   : > { %s3382_s24 = smov %s2236_s25  ;;  %27 = sbr.rel (!%p25_p10) target bundleno = 17 (0x11), region = 132 }
 0x162   : > { %s3383_s25 = smov %s3378_s15 }
 0x164   :  { %1585 = vsyncpa [#allocation3], 1 }
 0x165   :  { %1587 = vsyncpa [#allocation3 + $0x1], 1 }
 0x166   :  { %1588 = vsyncpa [#allocation7], 1 }
 0x167   :  { %1590 = vsyncpa [#allocation7 + $0x1], 1 }
 0x168   :  { %1591 = vsyncpa [#allocation4], 1 }
 0x169   :  { %1593 = vsyncpa [#allocation4 + $0x1], 1 }
 0x16a   :  { %1594 = vsyncpa [#allocation5], 1 }
 0x16b   :  { %1596 = vsyncpa [#allocation5 + $0x1], 1 }
 0x16c   :  { %1597 = vsyncpa [#allocation10], 1 }
 0x16d   :  { %1598 = vsyncpa [#allocation13], 1 }

</bundles_post_ra>
